<compile_context>
chip_gen: v5e
topology: v5e:2x2
jax: 0.10.0
libtpu: 0.0.40
codegen_flags: <defaults>
</compile_context>

<pallas_src>
import functools

import jax
import jax.numpy as jnp
import numpy as np
from jax.experimental import pallas as pl
from jax.experimental.pallas import tpu as pltpu

NUM_CLASSES = 10
BETA = 0.8
_NUM_OUT = 7      # s1, z_mix, i9_mix, i8_mix, boot, xent, s*max_9
_UNIT = 1024      # 8 sublanes * 128 lanes = one full f32 vreg of samples


def _hard_bootstrap_kernel(yp_ref, y_ref, out_ref):
    C = yp_ref.shape[0]
    f32 = jnp.float32
    i32 = jnp.int32

    yv = y_ref[...]                                     # (8, L) int32 labels
    zero = jnp.zeros(yv.shape, f32)
    neg1 = jnp.full(yv.shape, -1.0, f32)

    # ---- load & cast every class row exactly once ---------------------------
    x = [yp_ref[c, :, :].astype(f32) for c in range(C)]

    # ---- softmax / log-softmax over class rows (unrolled, pure VPU) ---------
    m = x[0]
    for c in range(1, C):
        m = jnp.maximum(m, x[c])
    shifted = [x[c] - m for c in range(C)]              # reused for -log_softmax
    ex = [jnp.exp(s) for s in shifted]
    denom = ex[0]
    for c in range(1, C):
        denom = denom + ex[c]
    inv_denom = pl.reciprocal(denom)                    # exact: fy < 0.1 selector
    log_denom = jnp.log(denom)
    p = [ex[c] * inv_denom for c in range(C)]           # softmax probs per class

    # ---- fused top-3 (value, index) scans (== torch kthvalue 10 / 9 / 8) ----
    v1 = p[0]
    i1 = jnp.zeros(yv.shape, i32)
    for c in range(1, C):
        take = p[c] > v1
        v1 = jnp.where(take, p[c], v1)
        i1 = jnp.where(take, jnp.int32(c), i1)

    v2 = neg1
    i2 = jnp.zeros(yv.shape, i32)
    for c in range(C):
        take = jnp.logical_and(i1 != c, p[c] > v2)
        v2 = jnp.where(take, p[c], v2)
        i2 = jnp.where(take, jnp.int32(c), i2)

    v3 = neg1
    i3 = jnp.zeros(yv.shape, i32)
    for c in range(C):
        take = jnp.logical_and(jnp.logical_and(i1 != c, i2 != c), p[c] > v3)
        v3 = jnp.where(take, p[c], v3)
        i3 = jnp.where(take, jnp.int32(c), i3)

    # ---- gather p at the true label, hard/soft selector ---------------------
    eqy = [yv == c for c in range(C)]                   # reused below
    fy = zero
    for c in range(C):
        fy = fy + jnp.where(eqy[c], p[c], zero)
    sel = fy < 0.1
    s1f = sel.astype(f32)
    # TODO(synk): the torch forward also computes zr, kthvalue(5), s2 and two
    # debug print()s; they are dead code / side effects and are omitted here.

    # ---- soft-target mixing + per-sample soft-cross-entropy -----------------
    msum = v1 + v2 + v3
    inv_msum = pl.reciprocal(msum, approx=True)         # EUP slot; weights only
    a1 = v1 * inv_msum
    a2 = v2 * inv_msum
    a3 = v3 * inv_msum

    # boot = s*(a1*nll[i1] + a2*nll[i2] + a3*nll[i3]) + (1-s)*nll[y]
    n1 = zero
    n2 = zero
    n3 = zero
    ny = zero
    for c in range(C):
        nll_c = log_denom - shifted[c]                  # -log_softmax, class c
        n1 = n1 + jnp.where(i1 == c, nll_c, zero)
        n2 = n2 + jnp.where(i2 == c, nll_c, zero)
        n3 = n3 + jnp.where(i3 == c, nll_c, zero)
        ny = ny + jnp.where(eqy[c], nll_c, zero)
    boot_row = s1f * (a1 * n1 + a2 * n2 + a3 * n3) + (1.0 - s1f) * ny
    xent_row = ny

    # ---- packed (7, 8, L) output slab: full unmasked stores, one DMA --------
    out_ref[0, :, :] = s1f
    out_ref[1, :, :] = jnp.where(sel, i1.astype(f32), neg1)   # s*z_max  +(1-s)*-1
    out_ref[2, :, :] = jnp.where(sel, i2.astype(f32), neg1)   # s*max9_d +(1-s)*-1
    out_ref[3, :, :] = jnp.where(sel, i3.astype(f32), neg1)   # s*max8_d +(1-s)*-1
    out_ref[4, :, :] = boot_row
    out_ref[5, :, :] = xent_row
    out_ref[6, :, :] = s1f * v2                               # s * max_9


def _round_up(v, m):
    return (v + m - 1) // m * m


def _choose_tile(B, b_tile):
    b_unit = _round_up(B, _UNIT)                  # minimal sublane-packed batch
    bt = min(_round_up(b_tile, _UNIT), b_unit)
    # v7x has 2 TensorCores; ensure a "parallel" grid has >= 2 steps whenever
    # there is enough work to split (measured noise on single-TC v5e/v6e).
    if bt >= b_unit and b_unit >= 2 * _UNIT:
        bt = _round_up(b_unit // 2, _UNIT)
    b_pad = _round_up(B, bt)
    return bt, b_pad


@functools.partial(jax.jit, static_argnames=("reduce", "b_tile"))
def hard_bootstrapping_loss(y_pred, y, beta=BETA, reduce=True, b_tile=2048):
    B, C = y_pred.shape
    assert C == NUM_CLASSES

    bt, b_pad = _choose_tile(B, b_tile)
    L = bt // 8
    rows = b_pad // L

    # Sublane-packed, lane-dense layout: (B_pad, C) -> (C, rows, L).  Each grid
    # tile owns an 8-row slab of `rows`, i.e. a full (8, L) vreg block per
    # class.  Pad + reshape + transpose are chained so XLA can emit one fused
    # relayout copy; no wrapper-side f32 cast (cast happens on in-VMEM rows).
    # TODO(synk): a producer emitting (C, B)-major logits would remove this
    # remaining HBM relayout pass entirely.
    pad = b_pad - B
    yp = y_pred if pad == 0 else jnp.pad(y_pred, ((0, pad), (0, 0)))
    yp_packed = jnp.transpose(yp.reshape(rows, L, C), (2, 0, 1))
    yv = y.astype(jnp.int32)
    yv = yv if pad == 0 else jnp.pad(yv, (0, pad))
    y_packed = yv.reshape(rows, L)

    out = pl.pallas_call(
        _hard_bootstrap_kernel,
        grid=(b_pad // bt,),
        in_specs=[
            pl.BlockSpec((C, 8, L), lambda i: (0, i, 0)),
            pl.BlockSpec((8, L), lambda i: (i, 0)),
        ],
        out_specs=pl.BlockSpec((_NUM_OUT, 8, L), lambda i: (0, i, 0)),
        out_shape=jax.ShapeDtypeStruct((_NUM_OUT, rows, L), jnp.float32),
        compiler_params=pltpu.CompilerParams(
            dimension_semantics=("parallel",)),
    )(yp_packed, y_packed)

    res = out.reshape(_NUM_OUT, b_pad)[:, :B]           # drop padded lanes first
    s1 = res[0].astype(jnp.int32)
    z_mix = res[1].astype(jnp.int32)
    i9_mix = res[2].astype(jnp.int32)
    i8_mix = res[3].astype(jnp.int32)
    boot = jnp.sum(res[4]) / jnp.float32(B)
    xent = res[5]
    sv9 = res[6]

    if reduce:
        cnt = jnp.int32(B) - jnp.sum(s1)                # (1 - s).sum()
        return (boot, s1, z_mix, i9_mix, i8_mix, cnt, sv9)
    return beta * xent + boot


def _reference(y_pred, y, beta=BETA, reduce=True):
    """Pure-JAX reference mirroring the torch forward."""
    B, C = y_pred.shape
    p = jax.nn.softmax(y_pred, axis=1)
    logp = jax.nn.log_softmax(y_pred, axis=1)
    order = jnp.argsort(p, axis=1)                      # ascending
    i1, i2, i3 = order[:, -1], order[:, -2], order[:, -3]
    take = lambda idx: jnp.take_along_axis(p, idx[:, None], 1)[:, 0]
    v1, v2, v3 = take(i1), take(i2), take(i3)
    fy = jnp.take_along_axis(p, y[:, None], 1)[:, 0]
    s1 = (fy < 0.1).astype(jnp.int32)
    msum = v1 + v2 + v3
    oh = lambda idx: jax.nn.one_hot(idx, C, dtype=jnp.float32)
    max3_num = (oh(i1) * (v1 / msum)[:, None] + oh(i2) * (v2 / msum)[:, None]
                + oh(i3) * (v3 / msum)[:, None])
    t_all = max3_num * s1[:, None].astype(jnp.float32) \
        + (1 - s1)[:, None].astype(jnp.float32) * oh(y)
    boot = jnp.sum(-logp * t_all) / B
    neg1 = 1 - s1
    if reduce:
        return (boot, s1,
                s1 * i1.astype(jnp.int32) + neg1 * (-1),
                s1 * i2.astype(jnp.int32) + neg1 * (-1),
                s1 * i3.astype(jnp.int32) + neg1 * (-1),
                jnp.sum(neg1),
                s1.astype(jnp.float32) * v2)
    ce = -jnp.take_along_axis(logp, y[:, None], 1)[:, 0]
    return beta * ce + boot


if __name__ == "__main__":
    key = jax.random.PRNGKey(0)

    # Small test (B=8): single 1024-sample tile, heavy padding path.
    k1, k2 = jax.random.split(key)
    B = 8
    y_pred = jax.random.normal(k1, (B, NUM_CLASSES), jnp.float32) * 3.0
    y = jax.random.randint(k2, (B,), 0, NUM_CLASSES, dtype=jnp.int32)

    outs = jax.block_until_ready(hard_bootstrapping_loss(y_pred, y, reduce=True))
    refs = _reference(y_pred, y, reduce=True)
    for a, b in zip(outs, refs):
        np.testing.assert_allclose(np.asarray(a, dtype=np.float64),
                                   np.asarray(b, dtype=np.float64),
                                   rtol=2e-3, atol=1e-6)

    out_nr = jax.block_until_ready(hard_bootstrapping_loss(y_pred, y, reduce=False))
    ref_nr = _reference(y_pred, y, reduce=False)
    np.testing.assert_allclose(np.asarray(out_nr), np.asarray(ref_nr),
                               rtol=2e-3, atol=1e-6)

    # Multi-tile test (B=2500, b_tile=1024): 3 parallel grid steps + batch pad.
    k3, k4 = jax.random.split(k2)
    B2 = 2500
    y_pred2 = jax.random.normal(k3, (B2, NUM_CLASSES), jnp.float32) * 3.0
    y2 = jax.random.randint(k4, (B2,), 0, NUM_CLASSES, dtype=jnp.int32)
    outs2 = jax.block_until_ready(
        hard_bootstrapping_loss(y_pred2, y2, reduce=True, b_tile=1024))
    refs2 = _reference(y_pred2, y2, reduce=True)
    for a, b in zip(outs2, refs2):
        np.testing.assert_allclose(np.asarray(a, dtype=np.float64),
                                   np.asarray(b, dtype=np.float64),
                                   rtol=2e-3, atol=1e-6)

    print("KERNEL_OK")
</pallas_src>

<mosaic_0001>
module attributes {stable_mosaic.version = 11 : i64} {
  func.func @_hard_bootstrap_kernel(%arg0: i32, %arg1: memref<10x8x128xf32, #tpu.memory_space<vmem>>, %arg2: memref<8x128xi32, #tpu.memory_space<vmem>>, %arg3: memref<7x8x128xf32, #tpu.memory_space<vmem>>) attributes {dimension_semantics = [#tpu.dimension_semantics<parallel>], iteration_bounds = array<i64: 1>, scalar_prefetch = 0 : i64, scratch_operands = 0 : i64, tpu.core_type = #tpu.core_type<tc>, window_params = [{transform_indices = @transform_0, window_bounds = array<i64: 10, 8, 128>}, {transform_indices = @transform_1, window_bounds = array<i64: 8, 128>}, {transform_indices = @transform_2, window_bounds = array<i64: 7, 8, 128>}]} {
    %c0 = arith.constant 0 : index
    %c0_0 = arith.constant 0 : index
    %0 = vector.load %arg2[%c0, %c0_0] : memref<8x128xi32, #tpu.memory_space<vmem>>, vector<8x128xi32>
    %cst = arith.constant 0.000000e+00 : f32
    %1 = vector.broadcast %cst : f32 to vector<8x128xf32>
    %cst_1 = arith.constant -1.000000e+00 : f32
    %2 = vector.broadcast %cst_1 : f32 to vector<8x128xf32>
    %c0_2 = arith.constant 0 : index
    %c0_3 = arith.constant 0 : index
    %c0_4 = arith.constant 0 : index
    %3 = vector.load %arg1[%c0_2, %c0_3, %c0_4] : memref<10x8x128xf32, #tpu.memory_space<vmem>>, vector<1x8x128xf32>
    %4 = vector.shape_cast %3 : vector<1x8x128xf32> to vector<8x128xf32>
    %c1 = arith.constant 1 : index
    %c0_5 = arith.constant 0 : index
    %c0_6 = arith.constant 0 : index
    %5 = vector.load %arg1[%c1, %c0_5, %c0_6] : memref<10x8x128xf32, #tpu.memory_space<vmem>>, vector<1x8x128xf32>
    %6 = vector.shape_cast %5 : vector<1x8x128xf32> to vector<8x128xf32>
    %c2 = arith.constant 2 : index
    %c0_7 = arith.constant 0 : index
    %c0_8 = arith.constant 0 : index
    %7 = vector.load %arg1[%c2, %c0_7, %c0_8] : memref<10x8x128xf32, #tpu.memory_space<vmem>>, vector<1x8x128xf32>
    %8 = vector.shape_cast %7 : vector<1x8x128xf32> to vector<8x128xf32>
    %c3 = arith.constant 3 : index
    %c0_9 = arith.constant 0 : index
    %c0_10 = arith.constant 0 : index
    %9 = vector.load %arg1[%c3, %c0_9, %c0_10] : memref<10x8x128xf32, #tpu.memory_space<vmem>>, vector<1x8x128xf32>
    %10 = vector.shape_cast %9 : vector<1x8x128xf32> to vector<8x128xf32>
    %c4 = arith.constant 4 : index
    %c0_11 = arith.constant 0 : index
    %c0_12 = arith.constant 0 : index
    %11 = vector.load %arg1[%c4, %c0_11, %c0_12] : memref<10x8x128xf32, #tpu.memory_space<vmem>>, vector<1x8x128xf32>
    %12 = vector.shape_cast %11 : vector<1x8x128xf32> to vector<8x128xf32>
    %c5 = arith.constant 5 : index
    %c0_13 = arith.constant 0 : index
    %c0_14 = arith.constant 0 : index
    %13 = vector.load %arg1[%c5, %c0_13, %c0_14] : memref<10x8x128xf32, #tpu.memory_space<vmem>>, vector<1x8x128xf32>
    %14 = vector.shape_cast %13 : vector<1x8x128xf32> to vector<8x128xf32>
    %c6 = arith.constant 6 : index
    %c0_15 = arith.constant 0 : index
    %c0_16 = arith.constant 0 : index
    %15 = vector.load %arg1[%c6, %c0_15, %c0_16] : memref<10x8x128xf32, #tpu.memory_space<vmem>>, vector<1x8x128xf32>
    %16 = vector.shape_cast %15 : vector<1x8x128xf32> to vector<8x128xf32>
    %c7 = arith.constant 7 : index
    %c0_17 = arith.constant 0 : index
    %c0_18 = arith.constant 0 : index
    %17 = vector.load %arg1[%c7, %c0_17, %c0_18] : memref<10x8x128xf32, #tpu.memory_space<vmem>>, vector<1x8x128xf32>
    %18 = vector.shape_cast %17 : vector<1x8x128xf32> to vector<8x128xf32>
    %c8 = arith.constant 8 : index
    %c0_19 = arith.constant 0 : index
    %c0_20 = arith.constant 0 : index
    %19 = vector.load %arg1[%c8, %c0_19, %c0_20] : memref<10x8x128xf32, #tpu.memory_space<vmem>>, vector<1x8x128xf32>
    %20 = vector.shape_cast %19 : vector<1x8x128xf32> to vector<8x128xf32>
    %c9 = arith.constant 9 : index
    %c0_21 = arith.constant 0 : index
    %c0_22 = arith.constant 0 : index
    %21 = vector.load %arg1[%c9, %c0_21, %c0_22] : memref<10x8x128xf32, #tpu.memory_space<vmem>>, vector<1x8x128xf32>
    %22 = vector.shape_cast %21 : vector<1x8x128xf32> to vector<8x128xf32>
    %23 = arith.maximumf %4, %6 : vector<8x128xf32>
    %24 = arith.maximumf %23, %8 : vector<8x128xf32>
    %25 = arith.maximumf %24, %10 : vector<8x128xf32>
    %26 = arith.maximumf %25, %12 : vector<8x128xf32>
    %27 = arith.maximumf %26, %14 : vector<8x128xf32>
    %28 = arith.maximumf %27, %16 : vector<8x128xf32>
    %29 = arith.maximumf %28, %18 : vector<8x128xf32>
    %30 = arith.maximumf %29, %20 : vector<8x128xf32>
    %31 = arith.maximumf %30, %22 : vector<8x128xf32>
    %32 = arith.subf %4, %31 : vector<8x128xf32>
    %33 = arith.subf %6, %31 : vector<8x128xf32>
    %34 = arith.subf %8, %31 : vector<8x128xf32>
    %35 = arith.subf %10, %31 : vector<8x128xf32>
    %36 = arith.subf %12, %31 : vector<8x128xf32>
    %37 = arith.subf %14, %31 : vector<8x128xf32>
    %38 = arith.subf %16, %31 : vector<8x128xf32>
    %39 = arith.subf %18, %31 : vector<8x128xf32>
    %40 = arith.subf %20, %31 : vector<8x128xf32>
    %41 = arith.subf %22, %31 : vector<8x128xf32>
    %42 = math.exp %32 : vector<8x128xf32>
    %43 = math.exp %33 : vector<8x128xf32>
    %44 = math.exp %34 : vector<8x128xf32>
    %45 = math.exp %35 : vector<8x128xf32>
    %46 = math.exp %36 : vector<8x128xf32>
    %47 = math.exp %37 : vector<8x128xf32>
    %48 = math.exp %38 : vector<8x128xf32>
    %49 = math.exp %39 : vector<8x128xf32>
    %50 = math.exp %40 : vector<8x128xf32>
    %51 = math.exp %41 : vector<8x128xf32>
    %52 = arith.addf %42, %43 : vector<8x128xf32>
    %53 = arith.addf %52, %44 : vector<8x128xf32>
    %54 = arith.addf %53, %45 : vector<8x128xf32>
    %55 = arith.addf %54, %46 : vector<8x128xf32>
    %56 = arith.addf %55, %47 : vector<8x128xf32>
    %57 = arith.addf %56, %48 : vector<8x128xf32>
    %58 = arith.addf %57, %49 : vector<8x128xf32>
    %59 = arith.addf %58, %50 : vector<8x128xf32>
    %60 = arith.addf %59, %51 : vector<8x128xf32>
    %61 = tpu.reciprocal %60 : vector<8x128xf32> -> vector<8x128xf32>
    %62 = math.log %60 : vector<8x128xf32>
    %63 = arith.mulf %42, %61 : vector<8x128xf32>
    %64 = arith.mulf %43, %61 : vector<8x128xf32>
    %65 = arith.mulf %44, %61 : vector<8x128xf32>
    %66 = arith.mulf %45, %61 : vector<8x128xf32>
    %67 = arith.mulf %46, %61 : vector<8x128xf32>
    %68 = arith.mulf %47, %61 : vector<8x128xf32>
    %69 = arith.mulf %48, %61 : vector<8x128xf32>
    %70 = arith.mulf %49, %61 : vector<8x128xf32>
    %71 = arith.mulf %50, %61 : vector<8x128xf32>
    %72 = arith.mulf %51, %61 : vector<8x128xf32>
    %c0_i32 = arith.constant 0 : i32
    %73 = vector.broadcast %c0_i32 : i32 to vector<8x128xi32>
    %74 = arith.cmpf ogt, %64, %63 : vector<8x128xf32>
    %75 = arith.select %74, %64, %63 : vector<8x128xi1>, vector<8x128xf32>
    %c1_i32 = arith.constant 1 : i32
    %76 = vector.broadcast %c1_i32 : i32 to vector<8x128xi32>
    %77 = arith.select %74, %76, %73 : vector<8x128xi1>, vector<8x128xi32>
    %78 = arith.cmpf ogt, %65, %75 : vector<8x128xf32>
    %79 = arith.select %78, %65, %75 : vector<8x128xi1>, vector<8x128xf32>
    %c2_i32 = arith.constant 2 : i32
    %80 = vector.broadcast %c2_i32 : i32 to vector<8x128xi32>
    %81 = arith.select %78, %80, %77 : vector<8x128xi1>, vector<8x128xi32>
    %82 = arith.cmpf ogt, %66, %79 : vector<8x128xf32>
    %83 = arith.select %82, %66, %79 : vector<8x128xi1>, vector<8x128xf32>
    %c3_i32 = arith.constant 3 : i32
    %84 = vector.broadcast %c3_i32 : i32 to vector<8x128xi32>
    %85 = arith.select %82, %84, %81 : vector<8x128xi1>, vector<8x128xi32>
    %86 = arith.cmpf ogt, %67, %83 : vector<8x128xf32>
    %87 = arith.select %86, %67, %83 : vector<8x128xi1>, vector<8x128xf32>
    %c4_i32 = arith.constant 4 : i32
    %88 = vector.broadcast %c4_i32 : i32 to vector<8x128xi32>
    %89 = arith.select %86, %88, %85 : vector<8x128xi1>, vector<8x128xi32>
    %90 = arith.cmpf ogt, %68, %87 : vector<8x128xf32>
    %91 = arith.select %90, %68, %87 : vector<8x128xi1>, vector<8x128xf32>
    %c5_i32 = arith.constant 5 : i32
    %92 = vector.broadcast %c5_i32 : i32 to vector<8x128xi32>
    %93 = arith.select %90, %92, %89 : vector<8x128xi1>, vector<8x128xi32>
    %94 = arith.cmpf ogt, %69, %91 : vector<8x128xf32>
    %95 = arith.select %94, %69, %91 : vector<8x128xi1>, vector<8x128xf32>
    %c6_i32 = arith.constant 6 : i32
    %96 = vector.broadcast %c6_i32 : i32 to vector<8x128xi32>
    %97 = arith.select %94, %96, %93 : vector<8x128xi1>, vector<8x128xi32>
    %98 = arith.cmpf ogt, %70, %95 : vector<8x128xf32>
    %99 = arith.select %98, %70, %95 : vector<8x128xi1>, vector<8x128xf32>
    %c7_i32 = arith.constant 7 : i32
    %100 = vector.broadcast %c7_i32 : i32 to vector<8x128xi32>
    %101 = arith.select %98, %100, %97 : vector<8x128xi1>, vector<8x128xi32>
    %102 = arith.cmpf ogt, %71, %99 : vector<8x128xf32>
    %103 = arith.select %102, %71, %99 : vector<8x128xi1>, vector<8x128xf32>
    %c8_i32 = arith.constant 8 : i32
    %104 = vector.broadcast %c8_i32 : i32 to vector<8x128xi32>
    %105 = arith.select %102, %104, %101 : vector<8x128xi1>, vector<8x128xi32>
    %106 = arith.cmpf ogt, %72, %103 : vector<8x128xf32>
    %107 = arith.select %106, %72, %103 : vector<8x128xi1>, vector<8x128xf32>
    %c9_i32 = arith.constant 9 : i32
    %108 = vector.broadcast %c9_i32 : i32 to vector<8x128xi32>
    %109 = arith.select %106, %108, %105 : vector<8x128xi1>, vector<8x128xi32>
    %c0_i32_23 = arith.constant 0 : i32
    %110 = vector.broadcast %c0_i32_23 : i32 to vector<8x128xi32>
    %c0_i32_24 = arith.constant 0 : i32
    %111 = vector.broadcast %c0_i32_24 : i32 to vector<8x128xi32>
    %112 = arith.cmpi ne, %109, %111 : vector<8x128xi32>
    %113 = arith.cmpf ogt, %63, %2 : vector<8x128xf32>
    %114 = arith.andi %112, %113 : vector<8x128xi1>
    %115 = arith.select %114, %63, %2 : vector<8x128xi1>, vector<8x128xf32>
    %c0_i32_25 = arith.constant 0 : i32
    %116 = vector.broadcast %c0_i32_25 : i32 to vector<8x128xi32>
    %117 = arith.select %114, %116, %110 : vector<8x128xi1>, vector<8x128xi32>
    %c1_i32_26 = arith.constant 1 : i32
    %118 = vector.broadcast %c1_i32_26 : i32 to vector<8x128xi32>
    %119 = arith.cmpi ne, %109, %118 : vector<8x128xi32>
    %120 = arith.cmpf ogt, %64, %115 : vector<8x128xf32>
    %121 = arith.andi %119, %120 : vector<8x128xi1>
    %122 = arith.select %121, %64, %115 : vector<8x128xi1>, vector<8x128xf32>
    %c1_i32_27 = arith.constant 1 : i32
    %123 = vector.broadcast %c1_i32_27 : i32 to vector<8x128xi32>
    %124 = arith.select %121, %123, %117 : vector<8x128xi1>, vector<8x128xi32>
    %c2_i32_28 = arith.constant 2 : i32
    %125 = vector.broadcast %c2_i32_28 : i32 to vector<8x128xi32>
    %126 = arith.cmpi ne, %109, %125 : vector<8x128xi32>
    %127 = arith.cmpf ogt, %65, %122 : vector<8x128xf32>
    %128 = arith.andi %126, %127 : vector<8x128xi1>
    %129 = arith.select %128, %65, %122 : vector<8x128xi1>, vector<8x128xf32>
    %c2_i32_29 = arith.constant 2 : i32
    %130 = vector.broadcast %c2_i32_29 : i32 to vector<8x128xi32>
    %131 = arith.select %128, %130, %124 : vector<8x128xi1>, vector<8x128xi32>
    %c3_i32_30 = arith.constant 3 : i32
    %132 = vector.broadcast %c3_i32_30 : i32 to vector<8x128xi32>
    %133 = arith.cmpi ne, %109, %132 : vector<8x128xi32>
    %134 = arith.cmpf ogt, %66, %129 : vector<8x128xf32>
    %135 = arith.andi %133, %134 : vector<8x128xi1>
    %136 = arith.select %135, %66, %129 : vector<8x128xi1>, vector<8x128xf32>
    %c3_i32_31 = arith.constant 3 : i32
    %137 = vector.broadcast %c3_i32_31 : i32 to vector<8x128xi32>
    %138 = arith.select %135, %137, %131 : vector<8x128xi1>, vector<8x128xi32>
    %c4_i32_32 = arith.constant 4 : i32
    %139 = vector.broadcast %c4_i32_32 : i32 to vector<8x128xi32>
    %140 = arith.cmpi ne, %109, %139 : vector<8x128xi32>
    %141 = arith.cmpf ogt, %67, %136 : vector<8x128xf32>
    %142 = arith.andi %140, %141 : vector<8x128xi1>
    %143 = arith.select %142, %67, %136 : vector<8x128xi1>, vector<8x128xf32>
    %c4_i32_33 = arith.constant 4 : i32
    %144 = vector.broadcast %c4_i32_33 : i32 to vector<8x128xi32>
    %145 = arith.select %142, %144, %138 : vector<8x128xi1>, vector<8x128xi32>
    %c5_i32_34 = arith.constant 5 : i32
    %146 = vector.broadcast %c5_i32_34 : i32 to vector<8x128xi32>
    %147 = arith.cmpi ne, %109, %146 : vector<8x128xi32>
    %148 = arith.cmpf ogt, %68, %143 : vector<8x128xf32>
    %149 = arith.andi %147, %148 : vector<8x128xi1>
    %150 = arith.select %149, %68, %143 : vector<8x128xi1>, vector<8x128xf32>
    %c5_i32_35 = arith.constant 5 : i32
    %151 = vector.broadcast %c5_i32_35 : i32 to vector<8x128xi32>
    %152 = arith.select %149, %151, %145 : vector<8x128xi1>, vector<8x128xi32>
    %c6_i32_36 = arith.constant 6 : i32
    %153 = vector.broadcast %c6_i32_36 : i32 to vector<8x128xi32>
    %154 = arith.cmpi ne, %109, %153 : vector<8x128xi32>
    %155 = arith.cmpf ogt, %69, %150 : vector<8x128xf32>
    %156 = arith.andi %154, %155 : vector<8x128xi1>
    %157 = arith.select %156, %69, %150 : vector<8x128xi1>, vector<8x128xf32>
    %c6_i32_37 = arith.constant 6 : i32
    %158 = vector.broadcast %c6_i32_37 : i32 to vector<8x128xi32>
    %159 = arith.select %156, %158, %152 : vector<8x128xi1>, vector<8x128xi32>
    %c7_i32_38 = arith.constant 7 : i32
    %160 = vector.broadcast %c7_i32_38 : i32 to vector<8x128xi32>
    %161 = arith.cmpi ne, %109, %160 : vector<8x128xi32>
    %162 = arith.cmpf ogt, %70, %157 : vector<8x128xf32>
    %163 = arith.andi %161, %162 : vector<8x128xi1>
    %164 = arith.select %163, %70, %157 : vector<8x128xi1>, vector<8x128xf32>
    %c7_i32_39 = arith.constant 7 : i32
    %165 = vector.broadcast %c7_i32_39 : i32 to vector<8x128xi32>
    %166 = arith.select %163, %165, %159 : vector<8x128xi1>, vector<8x128xi32>
    %c8_i32_40 = arith.constant 8 : i32
    %167 = vector.broadcast %c8_i32_40 : i32 to vector<8x128xi32>
    %168 = arith.cmpi ne, %109, %167 : vector<8x128xi32>
    %169 = arith.cmpf ogt, %71, %164 : vector<8x128xf32>
    %170 = arith.andi %168, %169 : vector<8x128xi1>
    %171 = arith.select %170, %71, %164 : vector<8x128xi1>, vector<8x128xf32>
    %c8_i32_41 = arith.constant 8 : i32
    %172 = vector.broadcast %c8_i32_41 : i32 to vector<8x128xi32>
    %173 = arith.select %170, %172, %166 : vector<8x128xi1>, vector<8x128xi32>
    %c9_i32_42 = arith.constant 9 : i32
    %174 = vector.broadcast %c9_i32_42 : i32 to vector<8x128xi32>
    %175 = arith.cmpi ne, %109, %174 : vector<8x128xi32>
    %176 = arith.cmpf ogt, %72, %171 : vector<8x128xf32>
    %177 = arith.andi %175, %176 : vector<8x128xi1>
    %178 = arith.select %177, %72, %171 : vector<8x128xi1>, vector<8x128xf32>
    %c9_i32_43 = arith.constant 9 : i32
    %179 = vector.broadcast %c9_i32_43 : i32 to vector<8x128xi32>
    %180 = arith.select %177, %179, %173 : vector<8x128xi1>, vector<8x128xi32>
    %c0_i32_44 = arith.constant 0 : i32
    %181 = vector.broadcast %c0_i32_44 : i32 to vector<8x128xi32>
    %c0_i32_45 = arith.constant 0 : i32
    %182 = vector.broadcast %c0_i32_45 : i32 to vector<8x128xi32>
    %183 = arith.cmpi ne, %109, %182 : vector<8x128xi32>
    %c0_i32_46 = arith.constant 0 : i32
    %184 = vector.broadcast %c0_i32_46 : i32 to vector<8x128xi32>
    %185 = arith.cmpi ne, %180, %184 : vector<8x128xi32>
    %186 = arith.andi %183, %185 : vector<8x128xi1>
    %187 = arith.cmpf ogt, %63, %2 : vector<8x128xf32>
    %188 = arith.andi %186, %187 : vector<8x128xi1>
    %189 = arith.select %188, %63, %2 : vector<8x128xi1>, vector<8x128xf32>
    %c0_i32_47 = arith.constant 0 : i32
    %190 = vector.broadcast %c0_i32_47 : i32 to vector<8x128xi32>
    %191 = arith.select %188, %190, %181 : vector<8x128xi1>, vector<8x128xi32>
    %c1_i32_48 = arith.constant 1 : i32
    %192 = vector.broadcast %c1_i32_48 : i32 to vector<8x128xi32>
    %193 = arith.cmpi ne, %109, %192 : vector<8x128xi32>
    %c1_i32_49 = arith.constant 1 : i32
    %194 = vector.broadcast %c1_i32_49 : i32 to vector<8x128xi32>
    %195 = arith.cmpi ne, %180, %194 : vector<8x128xi32>
    %196 = arith.andi %193, %195 : vector<8x128xi1>
    %197 = arith.cmpf ogt, %64, %189 : vector<8x128xf32>
    %198 = arith.andi %196, %197 : vector<8x128xi1>
    %199 = arith.select %198, %64, %189 : vector<8x128xi1>, vector<8x128xf32>
    %c1_i32_50 = arith.constant 1 : i32
    %200 = vector.broadcast %c1_i32_50 : i32 to vector<8x128xi32>
    %201 = arith.select %198, %200, %191 : vector<8x128xi1>, vector<8x128xi32>
    %c2_i32_51 = arith.constant 2 : i32
    %202 = vector.broadcast %c2_i32_51 : i32 to vector<8x128xi32>
    %203 = arith.cmpi ne, %109, %202 : vector<8x128xi32>
    %c2_i32_52 = arith.constant 2 : i32
    %204 = vector.broadcast %c2_i32_52 : i32 to vector<8x128xi32>
    %205 = arith.cmpi ne, %180, %204 : vector<8x128xi32>
    %206 = arith.andi %203, %205 : vector<8x128xi1>
    %207 = arith.cmpf ogt, %65, %199 : vector<8x128xf32>
    %208 = arith.andi %206, %207 : vector<8x128xi1>
    %209 = arith.select %208, %65, %199 : vector<8x128xi1>, vector<8x128xf32>
    %c2_i32_53 = arith.constant 2 : i32
    %210 = vector.broadcast %c2_i32_53 : i32 to vector<8x128xi32>
    %211 = arith.select %208, %210, %201 : vector<8x128xi1>, vector<8x128xi32>
    %c3_i32_54 = arith.constant 3 : i32
    %212 = vector.broadcast %c3_i32_54 : i32 to vector<8x128xi32>
    %213 = arith.cmpi ne, %109, %212 : vector<8x128xi32>
    %c3_i32_55 = arith.constant 3 : i32
    %214 = vector.broadcast %c3_i32_55 : i32 to vector<8x128xi32>
    %215 = arith.cmpi ne, %180, %214 : vector<8x128xi32>
    %216 = arith.andi %213, %215 : vector<8x128xi1>
    %217 = arith.cmpf ogt, %66, %209 : vector<8x128xf32>
    %218 = arith.andi %216, %217 : vector<8x128xi1>
    %219 = arith.select %218, %66, %209 : vector<8x128xi1>, vector<8x128xf32>
    %c3_i32_56 = arith.constant 3 : i32
    %220 = vector.broadcast %c3_i32_56 : i32 to vector<8x128xi32>
    %221 = arith.select %218, %220, %211 : vector<8x128xi1>, vector<8x128xi32>
    %c4_i32_57 = arith.constant 4 : i32
    %222 = vector.broadcast %c4_i32_57 : i32 to vector<8x128xi32>
    %223 = arith.cmpi ne, %109, %222 : vector<8x128xi32>
    %c4_i32_58 = arith.constant 4 : i32
    %224 = vector.broadcast %c4_i32_58 : i32 to vector<8x128xi32>
    %225 = arith.cmpi ne, %180, %224 : vector<8x128xi32>
    %226 = arith.andi %223, %225 : vector<8x128xi1>
    %227 = arith.cmpf ogt, %67, %219 : vector<8x128xf32>
    %228 = arith.andi %226, %227 : vector<8x128xi1>
    %229 = arith.select %228, %67, %219 : vector<8x128xi1>, vector<8x128xf32>
    %c4_i32_59 = arith.constant 4 : i32
    %230 = vector.broadcast %c4_i32_59 : i32 to vector<8x128xi32>
    %231 = arith.select %228, %230, %221 : vector<8x128xi1>, vector<8x128xi32>
    %c5_i32_60 = arith.constant 5 : i32
    %232 = vector.broadcast %c5_i32_60 : i32 to vector<8x128xi32>
    %233 = arith.cmpi ne, %109, %232 : vector<8x128xi32>
    %c5_i32_61 = arith.constant 5 : i32
    %234 = vector.broadcast %c5_i32_61 : i32 to vector<8x128xi32>
    %235 = arith.cmpi ne, %180, %234 : vector<8x128xi32>
    %236 = arith.andi %233, %235 : vector<8x128xi1>
    %237 = arith.cmpf ogt, %68, %229 : vector<8x128xf32>
    %238 = arith.andi %236, %237 : vector<8x128xi1>
    %239 = arith.select %238, %68, %229 : vector<8x128xi1>, vector<8x128xf32>
    %c5_i32_62 = arith.constant 5 : i32
    %240 = vector.broadcast %c5_i32_62 : i32 to vector<8x128xi32>
    %241 = arith.select %238, %240, %231 : vector<8x128xi1>, vector<8x128xi32>
    %c6_i32_63 = arith.constant 6 : i32
    %242 = vector.broadcast %c6_i32_63 : i32 to vector<8x128xi32>
    %243 = arith.cmpi ne, %109, %242 : vector<8x128xi32>
    %c6_i32_64 = arith.constant 6 : i32
    %244 = vector.broadcast %c6_i32_64 : i32 to vector<8x128xi32>
    %245 = arith.cmpi ne, %180, %244 : vector<8x128xi32>
    %246 = arith.andi %243, %245 : vector<8x128xi1>
    %247 = arith.cmpf ogt, %69, %239 : vector<8x128xf32>
    %248 = arith.andi %246, %247 : vector<8x128xi1>
    %249 = arith.select %248, %69, %239 : vector<8x128xi1>, vector<8x128xf32>
    %c6_i32_65 = arith.constant 6 : i32
    %250 = vector.broadcast %c6_i32_65 : i32 to vector<8x128xi32>
    %251 = arith.select %248, %250, %241 : vector<8x128xi1>, vector<8x128xi32>
    %c7_i32_66 = arith.constant 7 : i32
    %252 = vector.broadcast %c7_i32_66 : i32 to vector<8x128xi32>
    %253 = arith.cmpi ne, %109, %252 : vector<8x128xi32>
    %c7_i32_67 = arith.constant 7 : i32
    %254 = vector.broadcast %c7_i32_67 : i32 to vector<8x128xi32>
    %255 = arith.cmpi ne, %180, %254 : vector<8x128xi32>
    %256 = arith.andi %253, %255 : vector<8x128xi1>
    %257 = arith.cmpf ogt, %70, %249 : vector<8x128xf32>
    %258 = arith.andi %256, %257 : vector<8x128xi1>
    %259 = arith.select %258, %70, %249 : vector<8x128xi1>, vector<8x128xf32>
    %c7_i32_68 = arith.constant 7 : i32
    %260 = vector.broadcast %c7_i32_68 : i32 to vector<8x128xi32>
    %261 = arith.select %258, %260, %251 : vector<8x128xi1>, vector<8x128xi32>
    %c8_i32_69 = arith.constant 8 : i32
    %262 = vector.broadcast %c8_i32_69 : i32 to vector<8x128xi32>
    %263 = arith.cmpi ne, %109, %262 : vector<8x128xi32>
    %c8_i32_70 = arith.constant 8 : i32
    %264 = vector.broadcast %c8_i32_70 : i32 to vector<8x128xi32>
    %265 = arith.cmpi ne, %180, %264 : vector<8x128xi32>
    %266 = arith.andi %263, %265 : vector<8x128xi1>
    %267 = arith.cmpf ogt, %71, %259 : vector<8x128xf32>
    %268 = arith.andi %266, %267 : vector<8x128xi1>
    %269 = arith.select %268, %71, %259 : vector<8x128xi1>, vector<8x128xf32>
    %c8_i32_71 = arith.constant 8 : i32
    %270 = vector.broadcast %c8_i32_71 : i32 to vector<8x128xi32>
    %271 = arith.select %268, %270, %261 : vector<8x128xi1>, vector<8x128xi32>
    %c9_i32_72 = arith.constant 9 : i32
    %272 = vector.broadcast %c9_i32_72 : i32 to vector<8x128xi32>
    %273 = arith.cmpi ne, %109, %272 : vector<8x128xi32>
    %c9_i32_73 = arith.constant 9 : i32
    %274 = vector.broadcast %c9_i32_73 : i32 to vector<8x128xi32>
    %275 = arith.cmpi ne, %180, %274 : vector<8x128xi32>
    %276 = arith.andi %273, %275 : vector<8x128xi1>
    %277 = arith.cmpf ogt, %72, %269 : vector<8x128xf32>
    %278 = arith.andi %276, %277 : vector<8x128xi1>
    %279 = arith.select %278, %72, %269 : vector<8x128xi1>, vector<8x128xf32>
    %c9_i32_74 = arith.constant 9 : i32
    %280 = vector.broadcast %c9_i32_74 : i32 to vector<8x128xi32>
    %281 = arith.select %278, %280, %271 : vector<8x128xi1>, vector<8x128xi32>
    %c0_i32_75 = arith.constant 0 : i32
    %282 = vector.broadcast %c0_i32_75 : i32 to vector<8x128xi32>
    %283 = arith.cmpi eq, %0, %282 : vector<8x128xi32>
    %c1_i32_76 = arith.constant 1 : i32
    %284 = vector.broadcast %c1_i32_76 : i32 to vector<8x128xi32>
    %285 = arith.cmpi eq, %0, %284 : vector<8x128xi32>
    %c2_i32_77 = arith.constant 2 : i32
    %286 = vector.broadcast %c2_i32_77 : i32 to vector<8x128xi32>
    %287 = arith.cmpi eq, %0, %286 : vector<8x128xi32>
    %c3_i32_78 = arith.constant 3 : i32
    %288 = vector.broadcast %c3_i32_78 : i32 to vector<8x128xi32>
    %289 = arith.cmpi eq, %0, %288 : vector<8x128xi32>
    %c4_i32_79 = arith.constant 4 : i32
    %290 = vector.broadcast %c4_i32_79 : i32 to vector<8x128xi32>
    %291 = arith.cmpi eq, %0, %290 : vector<8x128xi32>
    %c5_i32_80 = arith.constant 5 : i32
    %292 = vector.broadcast %c5_i32_80 : i32 to vector<8x128xi32>
    %293 = arith.cmpi eq, %0, %292 : vector<8x128xi32>
    %c6_i32_81 = arith.constant 6 : i32
    %294 = vector.broadcast %c6_i32_81 : i32 to vector<8x128xi32>
    %295 = arith.cmpi eq, %0, %294 : vector<8x128xi32>
    %c7_i32_82 = arith.constant 7 : i32
    %296 = vector.broadcast %c7_i32_82 : i32 to vector<8x128xi32>
    %297 = arith.cmpi eq, %0, %296 : vector<8x128xi32>
    %c8_i32_83 = arith.constant 8 : i32
    %298 = vector.broadcast %c8_i32_83 : i32 to vector<8x128xi32>
    %299 = arith.cmpi eq, %0, %298 : vector<8x128xi32>
    %c9_i32_84 = arith.constant 9 : i32
    %300 = vector.broadcast %c9_i32_84 : i32 to vector<8x128xi32>
    %301 = arith.cmpi eq, %0, %300 : vector<8x128xi32>
    %302 = arith.select %283, %63, %1 : vector<8x128xi1>, vector<8x128xf32>
    %303 = arith.addf %1, %302 : vector<8x128xf32>
    %304 = arith.select %285, %64, %1 : vector<8x128xi1>, vector<8x128xf32>
    %305 = arith.addf %303, %304 : vector<8x128xf32>
    %306 = arith.select %287, %65, %1 : vector<8x128xi1>, vector<8x128xf32>
    %307 = arith.addf %305, %306 : vector<8x128xf32>
    %308 = arith.select %289, %66, %1 : vector<8x128xi1>, vector<8x128xf32>
    %309 = arith.addf %307, %308 : vector<8x128xf32>
    %310 = arith.select %291, %67, %1 : vector<8x128xi1>, vector<8x128xf32>
    %311 = arith.addf %309, %310 : vector<8x128xf32>
    %312 = arith.select %293, %68, %1 : vector<8x128xi1>, vector<8x128xf32>
    %313 = arith.addf %311, %312 : vector<8x128xf32>
    %314 = arith.select %295, %69, %1 : vector<8x128xi1>, vector<8x128xf32>
    %315 = arith.addf %313, %314 : vector<8x128xf32>
    %316 = arith.select %297, %70, %1 : vector<8x128xi1>, vector<8x128xf32>
    %317 = arith.addf %315, %316 : vector<8x128xf32>
    %318 = arith.select %299, %71, %1 : vector<8x128xi1>, vector<8x128xf32>
    %319 = arith.addf %317, %318 : vector<8x128xf32>
    %320 = arith.select %301, %72, %1 : vector<8x128xi1>, vector<8x128xf32>
    %321 = arith.addf %319, %320 : vector<8x128xf32>
    %cst_85 = arith.constant 1.000000e-01 : f32
    %322 = vector.broadcast %cst_85 : f32 to vector<8x128xf32>
    %323 = arith.cmpf olt, %321, %322 : vector<8x128xf32>
    %324 = arith.extui %323 : vector<8x128xi1> to vector<8x128xi32>
    %325 = arith.sitofp %324 : vector<8x128xi32> to vector<8x128xf32>
    %326 = arith.addf %107, %178 : vector<8x128xf32>
    %327 = arith.addf %326, %279 : vector<8x128xf32>
    %328 = tpu.reciprocal %327 {approx = true} : vector<8x128xf32> -> vector<8x128xf32>
    %329 = arith.mulf %107, %328 : vector<8x128xf32>
    %330 = arith.mulf %178, %328 : vector<8x128xf32>
    %331 = arith.mulf %279, %328 : vector<8x128xf32>
    %332 = arith.subf %62, %32 : vector<8x128xf32>
    %c0_i32_86 = arith.constant 0 : i32
    %333 = vector.broadcast %c0_i32_86 : i32 to vector<8x128xi32>
    %334 = arith.cmpi eq, %109, %333 : vector<8x128xi32>
    %335 = arith.select %334, %332, %1 : vector<8x128xi1>, vector<8x128xf32>
    %336 = arith.addf %1, %335 : vector<8x128xf32>
    %c0_i32_87 = arith.constant 0 : i32
    %337 = vector.broadcast %c0_i32_87 : i32 to vector<8x128xi32>
    %338 = arith.cmpi eq, %180, %337 : vector<8x128xi32>
    %339 = arith.select %338, %332, %1 : vector<8x128xi1>, vector<8x128xf32>
    %340 = arith.addf %1, %339 : vector<8x128xf32>
    %c0_i32_88 = arith.constant 0 : i32
    %341 = vector.broadcast %c0_i32_88 : i32 to vector<8x128xi32>
    %342 = arith.cmpi eq, %281, %341 : vector<8x128xi32>
    %343 = arith.select %342, %332, %1 : vector<8x128xi1>, vector<8x128xf32>
    %344 = arith.addf %1, %343 : vector<8x128xf32>
    %345 = arith.select %283, %332, %1 : vector<8x128xi1>, vector<8x128xf32>
    %346 = arith.addf %1, %345 : vector<8x128xf32>
    %347 = arith.subf %62, %33 : vector<8x128xf32>
    %c1_i32_89 = arith.constant 1 : i32
    %348 = vector.broadcast %c1_i32_89 : i32 to vector<8x128xi32>
    %349 = arith.cmpi eq, %109, %348 : vector<8x128xi32>
    %350 = arith.select %349, %347, %1 : vector<8x128xi1>, vector<8x128xf32>
    %351 = arith.addf %336, %350 : vector<8x128xf32>
    %c1_i32_90 = arith.constant 1 : i32
    %352 = vector.broadcast %c1_i32_90 : i32 to vector<8x128xi32>
    %353 = arith.cmpi eq, %180, %352 : vector<8x128xi32>
    %354 = arith.select %353, %347, %1 : vector<8x128xi1>, vector<8x128xf32>
    %355 = arith.addf %340, %354 : vector<8x128xf32>
    %c1_i32_91 = arith.constant 1 : i32
    %356 = vector.broadcast %c1_i32_91 : i32 to vector<8x128xi32>
    %357 = arith.cmpi eq, %281, %356 : vector<8x128xi32>
    %358 = arith.select %357, %347, %1 : vector<8x128xi1>, vector<8x128xf32>
    %359 = arith.addf %344, %358 : vector<8x128xf32>
    %360 = arith.select %285, %347, %1 : vector<8x128xi1>, vector<8x128xf32>
    %361 = arith.addf %346, %360 : vector<8x128xf32>
    %362 = arith.subf %62, %34 : vector<8x128xf32>
    %c2_i32_92 = arith.constant 2 : i32
    %363 = vector.broadcast %c2_i32_92 : i32 to vector<8x128xi32>
    %364 = arith.cmpi eq, %109, %363 : vector<8x128xi32>
    %365 = arith.select %364, %362, %1 : vector<8x128xi1>, vector<8x128xf32>
    %366 = arith.addf %351, %365 : vector<8x128xf32>
    %c2_i32_93 = arith.constant 2 : i32
    %367 = vector.broadcast %c2_i32_93 : i32 to vector<8x128xi32>
    %368 = arith.cmpi eq, %180, %367 : vector<8x128xi32>
    %369 = arith.select %368, %362, %1 : vector<8x128xi1>, vector<8x128xf32>
    %370 = arith.addf %355, %369 : vector<8x128xf32>
    %c2_i32_94 = arith.constant 2 : i32
    %371 = vector.broadcast %c2_i32_94 : i32 to vector<8x128xi32>
    %372 = arith.cmpi eq, %281, %371 : vector<8x128xi32>
    %373 = arith.select %372, %362, %1 : vector<8x128xi1>, vector<8x128xf32>
    %374 = arith.addf %359, %373 : vector<8x128xf32>
    %375 = arith.select %287, %362, %1 : vector<8x128xi1>, vector<8x128xf32>
    %376 = arith.addf %361, %375 : vector<8x128xf32>
    %377 = arith.subf %62, %35 : vector<8x128xf32>
    %c3_i32_95 = arith.constant 3 : i32
    %378 = vector.broadcast %c3_i32_95 : i32 to vector<8x128xi32>
    %379 = arith.cmpi eq, %109, %378 : vector<8x128xi32>
    %380 = arith.select %379, %377, %1 : vector<8x128xi1>, vector<8x128xf32>
    %381 = arith.addf %366, %380 : vector<8x128xf32>
    %c3_i32_96 = arith.constant 3 : i32
    %382 = vector.broadcast %c3_i32_96 : i32 to vector<8x128xi32>
    %383 = arith.cmpi eq, %180, %382 : vector<8x128xi32>
    %384 = arith.select %383, %377, %1 : vector<8x128xi1>, vector<8x128xf32>
    %385 = arith.addf %370, %384 : vector<8x128xf32>
    %c3_i32_97 = arith.constant 3 : i32
    %386 = vector.broadcast %c3_i32_97 : i32 to vector<8x128xi32>
    %387 = arith.cmpi eq, %281, %386 : vector<8x128xi32>
    %388 = arith.select %387, %377, %1 : vector<8x128xi1>, vector<8x128xf32>
    %389 = arith.addf %374, %388 : vector<8x128xf32>
    %390 = arith.select %289, %377, %1 : vector<8x128xi1>, vector<8x128xf32>
    %391 = arith.addf %376, %390 : vector<8x128xf32>
    %392 = arith.subf %62, %36 : vector<8x128xf32>
    %c4_i32_98 = arith.constant 4 : i32
    %393 = vector.broadcast %c4_i32_98 : i32 to vector<8x128xi32>
    %394 = arith.cmpi eq, %109, %393 : vector<8x128xi32>
    %395 = arith.select %394, %392, %1 : vector<8x128xi1>, vector<8x128xf32>
    %396 = arith.addf %381, %395 : vector<8x128xf32>
    %c4_i32_99 = arith.constant 4 : i32
    %397 = vector.broadcast %c4_i32_99 : i32 to vector<8x128xi32>
    %398 = arith.cmpi eq, %180, %397 : vector<8x128xi32>
    %399 = arith.select %398, %392, %1 : vector<8x128xi1>, vector<8x128xf32>
    %400 = arith.addf %385, %399 : vector<8x128xf32>
    %c4_i32_100 = arith.constant 4 : i32
    %401 = vector.broadcast %c4_i32_100 : i32 to vector<8x128xi32>
    %402 = arith.cmpi eq, %281, %401 : vector<8x128xi32>
    %403 = arith.select %402, %392, %1 : vector<8x128xi1>, vector<8x128xf32>
    %404 = arith.addf %389, %403 : vector<8x128xf32>
    %405 = arith.select %291, %392, %1 : vector<8x128xi1>, vector<8x128xf32>
    %406 = arith.addf %391, %405 : vector<8x128xf32>
    %407 = arith.subf %62, %37 : vector<8x128xf32>
    %c5_i32_101 = arith.constant 5 : i32
    %408 = vector.broadcast %c5_i32_101 : i32 to vector<8x128xi32>
    %409 = arith.cmpi eq, %109, %408 : vector<8x128xi32>
    %410 = arith.select %409, %407, %1 : vector<8x128xi1>, vector<8x128xf32>
    %411 = arith.addf %396, %410 : vector<8x128xf32>
    %c5_i32_102 = arith.constant 5 : i32
    %412 = vector.broadcast %c5_i32_102 : i32 to vector<8x128xi32>
    %413 = arith.cmpi eq, %180, %412 : vector<8x128xi32>
    %414 = arith.select %413, %407, %1 : vector<8x128xi1>, vector<8x128xf32>
    %415 = arith.addf %400, %414 : vector<8x128xf32>
    %c5_i32_103 = arith.constant 5 : i32
    %416 = vector.broadcast %c5_i32_103 : i32 to vector<8x128xi32>
    %417 = arith.cmpi eq, %281, %416 : vector<8x128xi32>
    %418 = arith.select %417, %407, %1 : vector<8x128xi1>, vector<8x128xf32>
    %419 = arith.addf %404, %418 : vector<8x128xf32>
    %420 = arith.select %293, %407, %1 : vector<8x128xi1>, vector<8x128xf32>
    %421 = arith.addf %406, %420 : vector<8x128xf32>
    %422 = arith.subf %62, %38 : vector<8x128xf32>
    %c6_i32_104 = arith.constant 6 : i32
    %423 = vector.broadcast %c6_i32_104 : i32 to vector<8x128xi32>
    %424 = arith.cmpi eq, %109, %423 : vector<8x128xi32>
    %425 = arith.select %424, %422, %1 : vector<8x128xi1>, vector<8x128xf32>
    %426 = arith.addf %411, %425 : vector<8x128xf32>
    %c6_i32_105 = arith.constant 6 : i32
    %427 = vector.broadcast %c6_i32_105 : i32 to vector<8x128xi32>
    %428 = arith.cmpi eq, %180, %427 : vector<8x128xi32>
    %429 = arith.select %428, %422, %1 : vector<8x128xi1>, vector<8x128xf32>
    %430 = arith.addf %415, %429 : vector<8x128xf32>
    %c6_i32_106 = arith.constant 6 : i32
    %431 = vector.broadcast %c6_i32_106 : i32 to vector<8x128xi32>
    %432 = arith.cmpi eq, %281, %431 : vector<8x128xi32>
    %433 = arith.select %432, %422, %1 : vector<8x128xi1>, vector<8x128xf32>
    %434 = arith.addf %419, %433 : vector<8x128xf32>
    %435 = arith.select %295, %422, %1 : vector<8x128xi1>, vector<8x128xf32>
    %436 = arith.addf %421, %435 : vector<8x128xf32>
    %437 = arith.subf %62, %39 : vector<8x128xf32>
    %c7_i32_107 = arith.constant 7 : i32
    %438 = vector.broadcast %c7_i32_107 : i32 to vector<8x128xi32>
    %439 = arith.cmpi eq, %109, %438 : vector<8x128xi32>
    %440 = arith.select %439, %437, %1 : vector<8x128xi1>, vector<8x128xf32>
    %441 = arith.addf %426, %440 : vector<8x128xf32>
    %c7_i32_108 = arith.constant 7 : i32
    %442 = vector.broadcast %c7_i32_108 : i32 to vector<8x128xi32>
    %443 = arith.cmpi eq, %180, %442 : vector<8x128xi32>
    %444 = arith.select %443, %437, %1 : vector<8x128xi1>, vector<8x128xf32>
    %445 = arith.addf %430, %444 : vector<8x128xf32>
    %c7_i32_109 = arith.constant 7 : i32
    %446 = vector.broadcast %c7_i32_109 : i32 to vector<8x128xi32>
    %447 = arith.cmpi eq, %281, %446 : vector<8x128xi32>
    %448 = arith.select %447, %437, %1 : vector<8x128xi1>, vector<8x128xf32>
    %449 = arith.addf %434, %448 : vector<8x128xf32>
    %450 = arith.select %297, %437, %1 : vector<8x128xi1>, vector<8x128xf32>
    %451 = arith.addf %436, %450 : vector<8x128xf32>
    %452 = arith.subf %62, %40 : vector<8x128xf32>
    %c8_i32_110 = arith.constant 8 : i32
    %453 = vector.broadcast %c8_i32_110 : i32 to vector<8x128xi32>
    %454 = arith.cmpi eq, %109, %453 : vector<8x128xi32>
    %455 = arith.select %454, %452, %1 : vector<8x128xi1>, vector<8x128xf32>
    %456 = arith.addf %441, %455 : vector<8x128xf32>
    %c8_i32_111 = arith.constant 8 : i32
    %457 = vector.broadcast %c8_i32_111 : i32 to vector<8x128xi32>
    %458 = arith.cmpi eq, %180, %457 : vector<8x128xi32>
    %459 = arith.select %458, %452, %1 : vector<8x128xi1>, vector<8x128xf32>
    %460 = arith.addf %445, %459 : vector<8x128xf32>
    %c8_i32_112 = arith.constant 8 : i32
    %461 = vector.broadcast %c8_i32_112 : i32 to vector<8x128xi32>
    %462 = arith.cmpi eq, %281, %461 : vector<8x128xi32>
    %463 = arith.select %462, %452, %1 : vector<8x128xi1>, vector<8x128xf32>
    %464 = arith.addf %449, %463 : vector<8x128xf32>
    %465 = arith.select %299, %452, %1 : vector<8x128xi1>, vector<8x128xf32>
    %466 = arith.addf %451, %465 : vector<8x128xf32>
    %467 = arith.subf %62, %41 : vector<8x128xf32>
    %c9_i32_113 = arith.constant 9 : i32
    %468 = vector.broadcast %c9_i32_113 : i32 to vector<8x128xi32>
    %469 = arith.cmpi eq, %109, %468 : vector<8x128xi32>
    %470 = arith.select %469, %467, %1 : vector<8x128xi1>, vector<8x128xf32>
    %471 = arith.addf %456, %470 : vector<8x128xf32>
    %c9_i32_114 = arith.constant 9 : i32
    %472 = vector.broadcast %c9_i32_114 : i32 to vector<8x128xi32>
    %473 = arith.cmpi eq, %180, %472 : vector<8x128xi32>
    %474 = arith.select %473, %467, %1 : vector<8x128xi1>, vector<8x128xf32>
    %475 = arith.addf %460, %474 : vector<8x128xf32>
    %c9_i32_115 = arith.constant 9 : i32
    %476 = vector.broadcast %c9_i32_115 : i32 to vector<8x128xi32>
    %477 = arith.cmpi eq, %281, %476 : vector<8x128xi32>
    %478 = arith.select %477, %467, %1 : vector<8x128xi1>, vector<8x128xf32>
    %479 = arith.addf %464, %478 : vector<8x128xf32>
    %480 = arith.select %301, %467, %1 : vector<8x128xi1>, vector<8x128xf32>
    %481 = arith.addf %466, %480 : vector<8x128xf32>
    %482 = arith.mulf %329, %471 : vector<8x128xf32>
    %483 = arith.mulf %330, %475 : vector<8x128xf32>
    %484 = arith.addf %482, %483 : vector<8x128xf32>
    %485 = arith.mulf %331, %479 : vector<8x128xf32>
    %486 = arith.addf %484, %485 : vector<8x128xf32>
    %487 = arith.mulf %325, %486 : vector<8x128xf32>
    %cst_116 = arith.constant 1.000000e+00 : f32
    %488 = vector.broadcast %cst_116 : f32 to vector<8x128xf32>
    %489 = arith.subf %488, %325 : vector<8x128xf32>
    %490 = arith.mulf %489, %481 : vector<8x128xf32>
    %491 = arith.addf %487, %490 : vector<8x128xf32>
    %c0_117 = arith.constant 0 : index
    %c0_118 = arith.constant 0 : index
    %c0_119 = arith.constant 0 : index
    %492 = vector.load %arg3[%c0_117, %c0_118, %c0_119] : memref<7x8x128xf32, #tpu.memory_space<vmem>>, vector<1x8x128xf32>
    %493 = vector.shape_cast %492 : vector<1x8x128xf32> to vector<8x128xf32>
    %494 = vector.shape_cast %325 : vector<8x128xf32> to vector<1x8x128xf32>
    tpu.vector_store %arg3[%c0_117, %c0_118, %c0_119], %494 {strides = array<i32>} : memref<7x8x128xf32, #tpu.memory_space<vmem>>, vector<1x8x128xf32>,
    %495 = arith.sitofp %109 : vector<8x128xi32> to vector<8x128xf32>
    %496 = arith.select %323, %495, %2 : vector<8x128xi1>, vector<8x128xf32>
    %c1_120 = arith.constant 1 : index
    %c0_121 = arith.constant 0 : index
    %c0_122 = arith.constant 0 : index
    %497 = vector.load %arg3[%c1_120, %c0_121, %c0_122] : memref<7x8x128xf32, #tpu.memory_space<vmem>>, vector<1x8x128xf32>
    %498 = vector.shape_cast %497 : vector<1x8x128xf32> to vector<8x128xf32>
    %499 = vector.shape_cast %496 : vector<8x128xf32> to vector<1x8x128xf32>
    tpu.vector_store %arg3[%c1_120, %c0_121, %c0_122], %499 {strides = array<i32>} : memref<7x8x128xf32, #tpu.memory_space<vmem>>, vector<1x8x128xf32>,
    %500 = arith.sitofp %180 : vector<8x128xi32> to vector<8x128xf32>
    %501 = arith.select %323, %500, %2 : vector<8x128xi1>, vector<8x128xf32>
    %c2_123 = arith.constant 2 : index
    %c0_124 = arith.constant 0 : index
    %c0_125 = arith.constant 0 : index
    %502 = vector.load %arg3[%c2_123, %c0_124, %c0_125] : memref<7x8x128xf32, #tpu.memory_space<vmem>>, vector<1x8x128xf32>
    %503 = vector.shape_cast %502 : vector<1x8x128xf32> to vector<8x128xf32>
    %504 = vector.shape_cast %501 : vector<8x128xf32> to vector<1x8x128xf32>
    tpu.vector_store %arg3[%c2_123, %c0_124, %c0_125], %504 {strides = array<i32>} : memref<7x8x128xf32, #tpu.memory_space<vmem>>, vector<1x8x128xf32>,
    %505 = arith.sitofp %281 : vector<8x128xi32> to vector<8x128xf32>
    %506 = arith.select %323, %505, %2 : vector<8x128xi1>, vector<8x128xf32>
    %c3_126 = arith.constant 3 : index
    %c0_127 = arith.constant 0 : index
    %c0_128 = arith.constant 0 : index
    %507 = vector.load %arg3[%c3_126, %c0_127, %c0_128] : memref<7x8x128xf32, #tpu.memory_space<vmem>>, vector<1x8x128xf32>
    %508 = vector.shape_cast %507 : vector<1x8x128xf32> to vector<8x128xf32>
    %509 = vector.shape_cast %506 : vector<8x128xf32> to vector<1x8x128xf32>
    tpu.vector_store %arg3[%c3_126, %c0_127, %c0_128], %509 {strides = array<i32>} : memref<7x8x128xf32, #tpu.memory_space<vmem>>, vector<1x8x128xf32>,
    %c4_129 = arith.constant 4 : index
    %c0_130 = arith.constant 0 : index
    %c0_131 = arith.constant 0 : index
    %510 = vector.load %arg3[%c4_129, %c0_130, %c0_131] : memref<7x8x128xf32, #tpu.memory_space<vmem>>, vector<1x8x128xf32>
    %511 = vector.shape_cast %510 : vector<1x8x128xf32> to vector<8x128xf32>
    %512 = vector.shape_cast %491 : vector<8x128xf32> to vector<1x8x128xf32>
    tpu.vector_store %arg3[%c4_129, %c0_130, %c0_131], %512 {strides = array<i32>} : memref<7x8x128xf32, #tpu.memory_space<vmem>>, vector<1x8x128xf32>,
    %c5_132 = arith.constant 5 : index
    %c0_133 = arith.constant 0 : index
    %c0_134 = arith.constant 0 : index
    %513 = vector.load %arg3[%c5_132, %c0_133, %c0_134] : memref<7x8x128xf32, #tpu.memory_space<vmem>>, vector<1x8x128xf32>
    %514 = vector.shape_cast %513 : vector<1x8x128xf32> to vector<8x128xf32>
    %515 = vector.shape_cast %481 : vector<8x128xf32> to vector<1x8x128xf32>
    tpu.vector_store %arg3[%c5_132, %c0_133, %c0_134], %515 {strides = array<i32>} : memref<7x8x128xf32, #tpu.memory_space<vmem>>, vector<1x8x128xf32>,
    %516 = arith.mulf %325, %178 : vector<8x128xf32>
    %c6_135 = arith.constant 6 : index
    %c0_136 = arith.constant 0 : index
    %c0_137 = arith.constant 0 : index
    %517 = vector.load %arg3[%c6_135, %c0_136, %c0_137] : memref<7x8x128xf32, #tpu.memory_space<vmem>>, vector<1x8x128xf32>
    %518 = vector.shape_cast %517 : vector<1x8x128xf32> to vector<8x128xf32>
    %519 = vector.shape_cast %516 : vector<8x128xf32> to vector<1x8x128xf32>
    tpu.vector_store %arg3[%c6_135, %c0_136, %c0_137], %519 {strides = array<i32>} : memref<7x8x128xf32, #tpu.memory_space<vmem>>, vector<1x8x128xf32>,
    return
  }
  func.func @transform_0(%arg0: i32) -> (i32, i32, i32) {
    %c0_i32 = arith.constant 0 : i32
    %c0_i32_0 = arith.constant 0 : i32
    %c0_i32_1 = arith.constant 0 : i32
    return %c0_i32, %arg0, %c0_i32_0 : i32, i32, i32
  }
  func.func @transform_1(%arg0: i32) -> (i32, i32) {
    %c0_i32 = arith.constant 0 : i32
    %c0_i32_0 = arith.constant 0 : i32
    return %arg0, %c0_i32 : i32, i32
  }
  func.func @transform_2(%arg0: i32) -> (i32, i32, i32) {
    %c0_i32 = arith.constant 0 : i32
    %c0_i32_0 = arith.constant 0 : i32
    %c0_i32_1 = arith.constant 0 : i32
    return %c0_i32, %arg0, %c0_i32_0 : i32, i32, i32
  }
}

</mosaic_0001>

<bundles_post_ra>
// kernel: hard_bootstrapping_loss.1
= control target key start
LH: loop header
LB: loop body
LE: loop exit
PB: predicated region body
PF: predicated region fallthrough
CT: control target
= control target key end

     0   :  { %s1040_s0 = inlined_call_operand.vmem [shape: f32[10,8,128], index: 0, kind: input, shape index: {}]   ;;  %s1041_s1 = inlined_call_operand.vmem [shape: s32[8,128], index: 1, kind: input, shape index: {}]   ;;  %s1042_s2 = inlined_call_operand.vmem [shape: f32[7,8,128], index: 2, kind: output, shape index: {}]  }
   0x1   :  { %v12_v0 = vld [vmem:[%s1040_s0] sm:$0xff]  ;;  %v431_v1 = vld [vmem:[%s1040_s0 + $0x8] sm:$0xff]  ;;  %v432_v2 = vld [vmem:[%s1040_s0 + $0x10] sm:$0xff] }
   0x2   :  { %v31_v3 = vmax.f32 %v12_v0, %v431_v1  ;;  %v433_v4 = vld [vmem:[%s1040_s0 + $0x18] sm:$0xff]  ;;  %v434_v6 = vld [vmem:[%s1040_s0 + $0x20] sm:$0xff]  ;;  %v435_v8 = vld [vmem:[%s1040_s0 + $0x28] sm:$0xff] }
   0x3   :  { %v436_v10 = vld [vmem:[%s1040_s0 + $0x30] sm:$0xff]  ;;  %v437_v12 = vld [vmem:[%s1040_s0 + $0x38] sm:$0xff]  ;;  %v438_v14 = vld [vmem:[%s1040_s0 + $0x40] sm:$0xff] }
   0x4   :  { %v32_v5 = vmax.f32 %v31_v3, %v432_v2  ;;  %v439_v16 = vld [vmem:[%s1040_s0 + $0x48] sm:$0xff] }
   0x6   :  { %v33_v7 = vmax.f32 %v32_v5, %v433_v4 }
   0x8   :  { %v34_v9 = vmax.f32 %v33_v7, %v434_v6 }
   0xa   :  { %v35_v11 = vmax.f32 %v34_v9, %v435_v8  ;;  %v475_v9 = vmov 0  }
   0xc   :  { %v36_v13 = vmax.f32 %v35_v11, %v436_v10 }
   0xe   :  { %v37_v15 = vmax.f32 %v36_v13, %v437_v12 }
  0x10   :  { %v38_v17 = vmax.f32 %v37_v15, %v438_v14 }
  0x12   :  { %v39_v18 = vmax.f32 %v38_v17, %v439_v16 }
  0x14   :  { %v522_v19 = vsub.f32 %v12_v0, %v39_v18  ;;  %v524_v20 = vsub.f32 %v431_v1, %v39_v18  ;;  %v526_v21 = vsub.f32 %v432_v2, %v39_v18  ;;  %v528_v22 = vsub.f32 %v433_v4, %v39_v18 }
  0x15   :  { %v530_v23 = vsub.f32 %v434_v6, %v39_v18  ;;  %v534_v26 = vsub.f32 %v435_v8, %v39_v18  ;;  %v538_v29 = vsub.f32 %v436_v10, %v39_v18  ;;  %v541_v31 = vsub.f32 %v437_v12, %v39_v18 }
  0x16   :  { %v50_v24 = vmul.f32 1.442695, %v522_v19  ;;  %v52_v25 = vmul.f32 1.442695, %v524_v20  ;;  %v54_v27 = vmul.f32 1.442695, %v526_v21  ;;  %v544_v33 = vsub.f32 %v438_v14, %v39_v18 }
  0x17   :  { %v56_v28 = vmul.f32 1.442695, %v528_v22  ;;  %v58_v30 = vmul.f32 1.442695, %v530_v23  ;;  %v60_v32 = vmul.f32 1.442695, %v534_v26  ;;  %v547_v37 = vsub.f32 %v439_v16, %v39_v18 }
  0x18   :  { %449 = vpow2.f32 %v50_v24  ;;  %v62_v34 = vmul.f32 1.442695, %v538_v29  ;;  %v64_v38 = vmul.f32 1.442695, %v541_v31  ;;  %v66_v42 = vmul.f32 1.442695, %v544_v33 }
  0x19   :  { %451 = vpow2.f32 %v52_v25  ;;  %v68_v45 = vmul.f32 1.442695, %v547_v37 }
  0x1a   :  { %453 = vpow2.f32 %v54_v27 }
  0x1b   :  { %455 = vpow2.f32 %v56_v28 }
  0x1c   :  { %457 = vpow2.f32 %v58_v30 }
  0x1d   :  { %459 = vpow2.f32 %v60_v32 }
  0x1e   :  { %v450_v35 = vpop.eup %449  ;;  %461 = vpow2.f32 %v62_v34 }
  0x1f   :  { %v452_v36 = vpop.eup %451  ;;  %463 = vpow2.f32 %v64_v38 }
  0x20   :  { %v454_v39 = vpop.eup %453  ;;  %v70_v40 = vadd.f32 %v452_v36, %v450_v35  ;;  %465 = vpow2.f32 %v66_v42 }
  0x21   :  { %v456_v41 = vpop.eup %455  ;;  %467 = vpow2.f32 %v68_v45 }
  0x22   :  { %v71_v43 = vadd.f32 %v454_v39, %v70_v40  ;;  %v458_v44 = vpop.eup %457 }
  0x23   :  { %v460_v47 = vpop.eup %459 }
  0x24   :  { %v72_v46 = vadd.f32 %v456_v41, %v71_v43  ;;  %v462_v49 = vpop.eup %461 }
  0x25   :  { %v464_v51 = vpop.eup %463 }
  0x26   :  { %v73_v48 = vadd.f32 %v458_v44, %v72_v46  ;;  %v466_v53 = vpop.eup %465 }
  0x27   :  { %v468_v55 = vpop.eup %467 }
  0x28   :  { %v74_v50 = vadd.f32 %v460_v47, %v73_v48 }
  0x2a   :  { %v75_v52 = vadd.f32 %v462_v49, %v74_v50 }
  0x2c   :  { %v76_v54 = vadd.f32 %v464_v51, %v75_v52 }
  0x2e   :  { %v77_v56 = vadd.f32 %v466_v53, %v76_v54 }
  0x30   :  { %v552_v57 = vadd.f32 %v468_v55, %v77_v56 }
  0x32   :  { %469 = vrcp.f32 %v552_v57  ;;  %v90_v60 = vand.u32 2147483648, %v552_v57  ;;  %vm84_vm0 = vweird.f32 %v552_v57  ;;  %v88_v62 = vand.u32 2147483647, %v552_v57 }
  0x33   :  { %471 = vlog2.f32 %v552_v57 }
  0x34   :  { %v91_v0 = vor.u32 1.1754944e-38, %v90_v60  ;;  %vm89_vm3 = vcmp.eq.f32.partialorder %v88_v62, 8.507059e+37 }
  0x38   :  { %v470_v58 = vpop.eup %469 }
  0x39   :  { %v80_v59 = vmul.f32 %v470_v58, %v552_v57  ;;  %vm85_vm1 = vweird.f32 %v470_v58 }
  0x3a   :  { %vm86_vm2 = vmor %vm84_vm0, %vm85_vm1 }
  0x3b   :  { %v81_v61 = vsub.f32 1.0, %v80_v59 }
  0x3d   :  { %v82_v63 = vmul.f32 %v470_v58, %v81_v61 }
  0x3f   :  { %v83_v1 = vadd.f32 %v470_v58, %v82_v63 }
  0x41   :  { %v87_v2 = vsel %vm86_vm2, %v470_v58, %v83_v1 }
  0x42   :  { %v92_v3 = vsel %vm89_vm3, %v91_v0, %v87_v2 }
  0x43   :  { %v559_v4 = vmul.f32 %v450_v35, %v92_v3  ;;  %v561_v5 = vmul.f32 %v452_v36, %v92_v3  ;;  %v563_v6 = vmul.f32 %v454_v39, %v92_v3  ;;  %v565_v7 = vmul.f32 %v456_v41, %v92_v3  ;;  %v600_v39 = vld [vmem:[%s1041_s1] sm:$0xff] }
  0x44   :  { %v572_v11 = vmul.f32 %v458_v44, %v92_v3  ;;  %v576_v14 = vmul.f32 %v460_v47, %v92_v3  ;;  %v580_v17 = vmul.f32 %v462_v49, %v92_v3  ;;  %v584_v25 = vmul.f32 %v464_v51, %v92_v3 }
  0x45   :  { %vm105_vm4 = vcmp.gt.f32.partialorder %v561_v5, %v559_v4  ;;  %v588_v30 = vmul.f32 %v466_v53, %v92_v3  ;;  %v592_v35 = vmul.f32 %v468_v55, %v92_v3  ;;  %vm133_vm13 = vcmp.gt.f32.partialorder %v559_v4, -1.0 }
  0x46   :  { %v106_v8 = vsel %vm105_vm4, %v561_v5, %v559_v4  ;;  %v107_v10 = vsel %vm105_vm4, 1, %v475_v9  ;;  %vm239_vm15 = vcmp.eq.s32.totalorder %v600_v39, 0  ;;  %vm240_vm0 = vcmp.eq.s32.totalorder %v600_v39, 1 }
  0x47   :  { %vm108_vm5 = vcmp.gt.f32.partialorder %v563_v6, %v106_v8  ;;  %vm1044_vm3 = vcmp.eq.s32.totalorder %v600_v39, 2  ;;  %vm1043_vm4 = vcmp.eq.s32.totalorder %v600_v39, 3  ;;  %v249_v44 = vsel %vm239_vm15, %v559_v4, 0.0 }
  0x48   :  { %v109_v12 = vsel %vm108_vm5, %v563_v6, %v106_v8  ;;  %v110_v13 = vsel %vm108_vm5, 2, %v107_v10  ;;  %v251_v45 = vsel %vm240_vm0, %v561_v5, 0.0  ;;  %v253_v47 = vsel %vm1044_vm3, %v563_v6, 0.0 }
  0x49   :  { %vm111_vm6 = vcmp.gt.f32.partialorder %v565_v7, %v109_v12  ;;  %v252_v46 = vadd.f32 %v251_v45, %v249_v44  ;;  %v255_v50 = vsel %vm1043_vm4, %v565_v7, 0.0  ;;  %vm1049_vm3 = vcmp.eq.s32.totalorder %v600_v39, 7 }
  0x4a   :  { %v112_v15 = vsel %vm111_vm6, %v565_v7, %v109_v12  ;;  %v113_v16 = vsel %vm111_vm6, 3, %v110_v13  ;;  %v263_v63 = vsel %vm1049_vm3, %v584_v25, 0.0 }
  0x4b   :  { %vm114_vm7 = vcmp.gt.f32.partialorder %v572_v11, %v112_v15  ;;  %v254_v51 = vadd.f32 %v253_v47, %v252_v46 }
  0x4c   :  { %v115_v18 = vsel %vm114_vm7, %v572_v11, %v112_v15  ;;  %v116_v24 = vsel %vm114_vm7, 4, %v113_v16 }
  0x4d   :  { %vm117_vm8 = vcmp.gt.f32.partialorder %v576_v14, %v115_v18  ;;  %v256_v55 = vadd.f32 %v255_v50, %v254_v51 }
  0x4e   :  { %v118_v27 = vsel %vm117_vm8, %v576_v14, %v115_v18  ;;  %v119_v28 = vsel %vm117_vm8, 5, %v116_v24  ;;  %vm1045_vm8 = vcmp.eq.s32.totalorder %v600_v39, 4 }
  0x4f   :  { %vm120_vm9 = vcmp.gt.f32.partialorder %v580_v17, %v118_v27  ;;  %v257_v52 = vsel %vm1045_vm8, %v572_v11, 0.0  ;;  %vm1050_vm8 = vcmp.eq.s32.totalorder %v600_v39, 8 }
  0x50   :  { %v121_v32 = vsel %vm120_vm9, %v580_v17, %v118_v27  ;;  %v122_v34 = vsel %vm120_vm9, 6, %v119_v28  ;;  %v258_v58 = vadd.f32 %v257_v52, %v256_v55  ;;  %v265_v3 = vsel %vm1050_vm8, %v588_v30, 0.0  ;;  %v472_v27 = vpop.eup %471 }
  0x51   :  { %vm123_vm10 = vcmp.gt.f32.partialorder %v584_v25, %v121_v32 }
  0x52   :  { %v124_v36 = vsel %vm123_vm10, %v584_v25, %v121_v32  ;;  %v125_v38 = vsel %vm123_vm10, 7, %v122_v34  ;;  %vm1046_vm10 = vcmp.eq.s32.totalorder %v600_v39, 5  ;;  %v476_v34 = vmov 0.0  }
  0x53   :  { %vm126_vm11 = vcmp.gt.f32.partialorder %v588_v30, %v124_v36  ;;  %v259_v56 = vsel %vm1046_vm10, %v576_v14, 0.0 }
  0x54   :  { %v603_v40 = vsel %vm126_vm11, %v588_v30, %v124_v36  ;;  %v128_v41 = vsel %vm126_vm11, 8, %v125_v38  ;;  %v260_v62 = vadd.f32 %v259_v56, %v258_v58 }
  0x55   :  { %vm129_vm12 = vcmp.gt.f32.partialorder %v592_v35, %v603_v40 }
  0x56   :  { %v611_v42 = vsel %vm129_vm12, 9, %v128_v41  ;;  %v712_v41 = vmul.f32 0.6931472, %v472_v27 }
  0x57   :  { %vm132_vm14 = vcmp.ne.s32.totalorder %v611_v42, 0  ;;  %vm136_vm2 = vcmp.ne.s32.totalorder %v611_v42, 1  ;;  %vm141_vm7 = vcmp.ne.s32.totalorder %v611_v42, 2  ;;  %vm1048_vm4 = vcmp.ne.s32.totalorder %v611_v42, 4 }
  0x58   :  { %vm134_vm1 = vmand %vm132_vm14, %vm133_vm13  ;;  %vm1052_vm10 = vcmp.ne.s32.totalorder %v611_v42, 5  ;;  %vm1054_vm8 = vcmp.ne.s32.totalorder %v611_v42, 7  ;;  %v408_v15 = vcvt.s32.f32 %v611_v42  ;;  %v725_v45 = vsub.f32 %v712_v41, %v522_v19 }
  0x59   :  { %v135_v43 = vsel %vm134_vm1, %v559_v4, -1.0  ;;  %vm1057_vm1 = vcmp.ne.s32.totalorder %v611_v42, 3  ;;  %v729_v46 = vsub.f32 %v712_v41, %v524_v20  ;;  %v755_v50 = vsub.f32 %v712_v41, %v526_v21 }
  0x5a   :  { %vm137_vm5 = vcmp.gt.f32.partialorder %v561_v5, %v135_v43  ;;  %v775_v21 = vsel %vm129_vm12, %v592_v35, %v603_v40  ;;  %v288_v55 = vsel %vm239_vm15, %v725_v45, 0.0  ;;  %v851_v27 = vsub.f32 %v712_v41, %v530_v23 }
  0x5b   :  { %vm138_vm6 = vmand %vm136_vm2, %vm137_vm5  ;;  %vm1047_vm5 = vcmp.eq.s32.totalorder %v600_v39, 6  ;;  %v300_v40 = vsel %vm240_vm0, %v729_v46, 0.0 }
  0x5c   :  { %v139_v48 = vsel %vm138_vm6, %v561_v5, %v135_v43  ;;  %v140_v49 = vsel %vm138_vm6, 1, %v475_v9  ;;  %v261_v61 = vsel %vm1047_vm5, %v580_v17, 0.0 }
  0x5d   :  { %vm142_vm9 = vcmp.gt.f32.partialorder %v563_v6, %v139_v48  ;;  %v262_v2 = vadd.f32 %v261_v61, %v260_v62  ;;  %v301_v61 = vadd.f32 %v300_v40, %v288_v55 }
  0x5e   :  { %vm143_vm11 = vmand %vm141_vm7, %vm142_vm9 }
  0x5f   :  { %v144_v53 = vsel %vm143_vm11, %v563_v6, %v139_v48  ;;  %v145_v54 = vsel %vm143_vm11, 2, %v140_v49  ;;  %v264_v8 = vadd.f32 %v263_v63, %v262_v2  ;;  %v824_v2 = vsub.f32 %v712_v41, %v528_v22 }
  0x60   :  { %vm147_vm6 = vcmp.gt.f32.partialorder %v565_v7, %v144_v53 }
  0x61   :  { %vm148_vm9 = vmand %vm1057_vm1, %vm147_vm6  ;;  %v266_v57 = vadd.f32 %v265_v3, %v264_v8  ;;  %vm303_vm1 = vcmp.eq.s32.totalorder %v611_v42, 2 }
  0x62   :  { %v149_v59 = vsel %vm148_vm9, %v565_v7, %v144_v53  ;;  %v150_v60 = vsel %vm148_vm9, 3, %v145_v54  ;;  %vm1051_vm9 = vcmp.eq.s32.totalorder %v600_v39, 9  ;;  %v304_v56 = vsel %vm303_vm1, %v755_v50, 0.0 }
  0x63   :  { %vm152_vm11 = vcmp.gt.f32.partialorder %v572_v11, %v149_v59  ;;  %v267_v13 = vsel %vm1051_vm9, %v592_v35, 0.0  ;;  %vm1053_vm9 = vcmp.ne.s32.totalorder %v611_v42, 8 }
  0x64   :  { %vm153_vm6 = vmand %vm1048_vm4, %vm152_vm11  ;;  %vm1055_vm4 = vcmp.ne.s32.totalorder %v611_v42, 6  ;;  %v693_v24 = vadd.f32 %v267_v13, %v266_v57 }
  0x65   :  { %v154_v0 = vsel %vm153_vm6, %v572_v11, %v149_v59  ;;  %v155_v1 = vsel %vm153_vm6, 4, %v150_v60 }
  0x66   :  { %vm157_vm5 = vcmp.gt.f32.partialorder %v576_v14, %v154_v0 }
  0x67   :  { %vm158_vm11 = vmand %vm1052_vm10, %vm157_vm5  ;;  %vm1058_vm10 = vcmp.lt.f32.partialorder %v693_v24, 0.1 }
  0x68   :  { %v159_v10 = vsel %vm158_vm11, %v576_v14, %v154_v0  ;;  %v160_v12 = vsel %vm158_vm11, 5, %v155_v1  ;;  %v703_v36 = vsel %vm1058_vm10, 1.0, %v476_v34  ;;  %v409_v38 = vsel %vm1058_vm10, %v408_v15, -1.0 }
  0x69   :  { %vm162_vm6 = vcmp.gt.f32.partialorder %v580_v17, %v159_v10  ;;  %407 = vst [vmem:[%s1042_s2] sm:$0xff] %v703_v36 }
  0x6a   :  { %vm163_vm3 = vmand %vm1055_vm4, %vm162_vm6  ;;  %441 = vst [vmem:[%s1042_s2 + $0x8] sm:$0xff] %v409_v38 }
  0x6b   :  { %v164_v16 = vsel %vm163_vm3, %v580_v17, %v159_v10  ;;  %v165_v18 = vsel %vm163_vm3, 6, %v160_v12 }
  0x6c   :  { %vm167_vm5 = vcmp.gt.f32.partialorder %v584_v25, %v164_v16 }
  0x6d   :  { %vm168_vm11 = vmand %vm1054_vm8, %vm167_vm5  ;;  %vm1056_vm5 = vcmp.ne.s32.totalorder %v611_v42, 9 }
  0x6e   :  { %v169_v28 = vsel %vm168_vm11, %v584_v25, %v164_v16  ;;  %v170_v32 = vsel %vm168_vm11, 7, %v165_v18 }
  0x6f   :  { %vm172_vm3 = vcmp.gt.f32.partialorder %v588_v30, %v169_v28 }
  0x70   :  { %vm173_vm6 = vmand %vm1053_vm9, %vm172_vm3  ;;  %vm279_vm3 = vcmp.eq.s32.totalorder %v611_v42, 0  ;;  %vm291_vm9 = vcmp.eq.s32.totalorder %v611_v42, 1 }
  0x71   :  { %v721_v43 = vsel %vm173_vm6, %v588_v30, %v169_v28  ;;  %v175_v44 = vsel %vm173_vm6, 8, %v170_v32  ;;  %v280_v20 = vsel %vm279_vm3, %v725_v45, 0.0  ;;  %v292_v48 = vsel %vm291_vm9, %v729_v46, 0.0 }
  0x72   :  { %vm177_vm11 = vcmp.gt.f32.partialorder %v592_v35, %v721_v43  ;;  %v293_v52 = vadd.f32 %v292_v48, %v280_v20 }
  0x73   :  { %vm737_vm8 = vmand %vm1056_vm5, %vm177_vm11 }
  0x74   :  { %v743_v19 = vsel %vm737_vm8, 9, %v175_v44  ;;  %v305_v0 = vadd.f32 %v304_v56, %v293_v52  ;;  %v906_v56 = vsub.f32 %v712_v41, %v538_v29 }
  0x75   :  { %v412_v49 = vcvt.s32.f32 %v743_v19  ;;  %vm181_vm6 = vcmp.ne.s32.totalorder %v743_v19, 0  ;;  %vm185_vm4 = vcmp.ne.s32.totalorder %v743_v19, 1  ;;  %vm191_vm5 = vcmp.ne.s32.totalorder %v743_v19, 2 }
  0x76   :  { %vm182_vm11 = vmand %vm132_vm14, %vm181_vm6  ;;  %vm197_vm3 = vcmp.ne.s32.totalorder %v743_v19, 3  ;;  %vm203_vm6 = vcmp.ne.s32.totalorder %v743_v19, 4 }
  0x77   :  { %v413_v51 = vsel %vm1058_vm10, %v412_v49, -1.0  ;;  %vm183_vm9 = vmand %vm182_vm11, %vm133_vm13  ;;  %vm282_vm13 = vcmp.eq.s32.totalorder %v743_v19, 0  ;;  %v879_v49 = vsub.f32 %v712_v41, %v534_v26 }
  0x78   :  { %442 = vst [vmem:[%s1042_s2 + $0x10] sm:$0xff] %v413_v51  ;;  %v184_v53 = vsel %vm183_vm9, %v559_v4, -1.0  ;;  %vm186_vm14 = vmand %vm136_vm2, %vm185_vm4  ;;  %vm209_vm2 = vcmp.ne.s32.totalorder %v743_v19, 5  ;;  %v283_v54 = vsel %vm282_vm13, %v725_v45, 0.0  ;;  %vm215_vm4 = vcmp.ne.s32.totalorder %v743_v19, 6 }
  0x79   :  { %vm187_vm11 = vcmp.gt.f32.partialorder %v561_v5, %v184_v53  ;;  %vm781_vm10 = vmand %vm141_vm7, %vm191_vm5  ;;  %vm294_vm9 = vcmp.eq.s32.totalorder %v743_v19, 1  ;;  %vm306_vm7 = vcmp.eq.s32.totalorder %v743_v19, 2  ;;  %vm1063_vm5 = vcmp.ne.s32.totalorder %v611_v42, 3 }
  0x7a   :  { %vm188_vm12 = vmand %vm186_vm14, %vm187_vm11  ;;  %v295_v60 = vsel %vm294_vm9, %v729_v46, 0.0  ;;  %v307_v1 = vsel %vm306_vm7, %v755_v50, 0.0  ;;  %vm221_vm14 = vcmp.ne.s32.totalorder %v743_v19, 7  ;;  %vm1068_vm13 = vcmp.eq.s32.totalorder %v600_v39, 2 }
  0x7b   :  { %v189_v58 = vsel %vm188_vm12, %v561_v5, %v184_v53  ;;  %v190_v59 = vsel %vm188_vm12, 1, %v475_v9  ;;  %vm807_vm0 = vmand %vm1063_vm5, %vm197_vm3  ;;  %v296_v63 = vadd.f32 %v295_v60, %v283_v54  ;;  %v312_v9 = vsel %vm1068_vm13, %v755_v50, 0.0 }
  0x7c   :  { %vm193_vm15 = vcmp.gt.f32.partialorder %v563_v6, %v189_v58  ;;  %vm315_vm3 = vcmp.eq.s32.totalorder %v611_v42, 3  ;;  %vm318_vm11 = vcmp.eq.s32.totalorder %v743_v19, 3  ;;  %v313_v12 = vadd.f32 %v312_v9, %v301_v61 }
  0x7d   :  { %vm814_vm1 = vmand %vm781_vm10, %vm193_vm15  ;;  %v308_v10 = vadd.f32 %v307_v1, %v296_v63  ;;  %vm1069_vm12 = vcmp.ne.s32.totalorder %v611_v42, 4  ;;  %v316_v13 = vsel %vm315_vm3, %v824_v2, 0.0  ;;  %v319_v57 = vsel %vm318_vm11, %v824_v2, 0.0 }
  0x7e   :  { %v195_v3 = vsel %vm814_vm1, %v563_v6, %v189_v58  ;;  %v196_v8 = vsel %vm814_vm1, 2, %v190_v59  ;;  %vm838_vm9 = vmand %vm1069_vm12, %vm203_vm6  ;;  %vm1072_vm7 = vcmp.eq.s32.totalorder %v600_v39, 3  ;;  %v317_v15 = vadd.f32 %v316_v13, %v305_v0 }
  0x7f   :  { %vm199_vm10 = vcmp.gt.f32.partialorder %v565_v7, %v195_v3  ;;  %v324_v6 = vsel %vm1072_vm7, %v824_v2, 0.0  ;;  %v320_v16 = vadd.f32 %v319_v57, %v308_v10  ;;  %vm327_vm6 = vcmp.eq.s32.totalorder %v611_v42, 4 }
  0x80   :  { %vm200_vm15 = vmand %vm807_vm0, %vm199_vm10  ;;  %v325_v18 = vadd.f32 %v324_v6, %v313_v12  ;;  %vm330_vm5 = vcmp.eq.s32.totalorder %v743_v19, 4  ;;  %vm1073_vm0 = vcmp.ne.s32.totalorder %v611_v42, 5  ;;  %v328_v23 = vsel %vm327_vm6, %v851_v27, 0.0 }
  0x81   :  { %v201_v28 = vsel %vm200_vm15, %v565_v7, %v195_v3  ;;  %v202_v32 = vsel %vm200_vm15, 3, %v196_v8  ;;  %vm861_vm13 = vmand %vm1073_vm0, %vm209_vm2  ;;  %v331_v38 = vsel %vm330_vm5, %v851_v27, 0.0  ;;  %vm1076_vm3 = vcmp.eq.s32.totalorder %v600_v39, 4 }
  0x82   :  { %vm205_vm1 = vcmp.gt.f32.partialorder %v572_v11, %v201_v28  ;;  %v336_v7 = vsel %vm1076_vm3, %v851_v27, 0.0  ;;  %vm227_vm10 = vcmp.ne.s32.totalorder %v743_v19, 8  ;;  %v329_v20 = vadd.f32 %v328_v23, %v317_v15 }
  0x83   :  { %vm872_vm11 = vmand %vm838_vm9, %vm205_vm1  ;;  %v337_v48 = vadd.f32 %v336_v7, %v325_v18  ;;  %vm339_vm2 = vcmp.eq.s32.totalorder %v611_v42, 5  ;;  %vm342_vm12 = vcmp.eq.s32.totalorder %v743_v19, 5  ;;  %vm1079_vm7 = vcmp.ne.s32.totalorder %v611_v42, 6 }
  0x84   :  { %v207_v51 = vsel %vm872_vm11, %v572_v11, %v201_v28  ;;  %v208_v52 = vsel %vm872_vm11, 4, %v202_v32  ;;  %vm893_vm15 = vmand %vm1079_vm7, %vm215_vm4  ;;  %v332_v53 = vadd.f32 %v331_v38, %v320_v16  ;;  %v340_v11 = vsel %vm339_vm2, %v879_v49, 0.0 }
  0x85   :  { %vm211_vm9 = vcmp.gt.f32.partialorder %v576_v14, %v207_v51  ;;  %vm1082_vm6 = vcmp.eq.s32.totalorder %v600_v39, 5  ;;  %v341_v54 = vadd.f32 %v340_v11, %v329_v20  ;;  %v343_v55 = vsel %vm342_vm12, %v879_v49, 0.0 }
  0x86   :  { %v348_v4 = vsel %vm1082_vm6, %v879_v49, 0.0  ;;  %vm212_vm5 = vmand %vm861_vm13, %vm211_vm9  ;;  %vm351_vm4 = vcmp.eq.s32.totalorder %v611_v42, 6  ;;  %vm354_vm1 = vcmp.eq.s32.totalorder %v743_v19, 6  ;;  %vm1083_vm13 = vcmp.ne.s32.totalorder %v611_v42, 7 }
  0x87   :  { %v349_v40 = vadd.f32 %v348_v4, %v337_v48  ;;  %v213_v58 = vsel %vm212_vm5, %v576_v14, %v207_v51  ;;  %v214_v59 = vsel %vm212_vm5, 5, %v208_v52  ;;  %vm916_vm3 = vmand %vm1083_vm13, %vm221_vm14  ;;  %vm233_vm11 = vcmp.ne.s32.totalorder %v743_v19, 9 }
  0x88   :  { %vm217_vm0 = vcmp.gt.f32.partialorder %v580_v17, %v213_v58  ;;  %v352_v29 = vsel %vm351_vm4, %v906_v56, 0.0  ;;  %vm1086_vm2 = vcmp.eq.s32.totalorder %v600_v39, 6  ;;  %v344_v62 = vadd.f32 %v343_v55, %v332_v53 }
  0x89   :  { %v360_v14 = vsel %vm1086_vm2, %v906_v56, 0.0  ;;  %vm927_vm12 = vmand %vm893_vm15, %vm217_vm0  ;;  %v353_v63 = vadd.f32 %v352_v29, %v341_v54  ;;  %v933_v1 = vsub.f32 %v712_v41, %v541_v31  ;;  %v355_v3 = vsel %vm354_vm1, %v906_v56, 0.0 }
  0x8a   :  { %v361_v0 = vadd.f32 %v360_v14, %v349_v40  ;;  %v219_v5 = vsel %vm927_vm12, %v580_v17, %v213_v58  ;;  %v220_v9 = vsel %vm927_vm12, 6, %v214_v59  ;;  %vm363_vm14 = vcmp.eq.s32.totalorder %v611_v42, 7 }
  0x8b   :  { %vm223_vm9 = vcmp.gt.f32.partialorder %v584_v25, %v219_v5  ;;  %vm1089_vm7 = vcmp.ne.s32.totalorder %v611_v42, 8  ;;  %v364_v8 = vsel %vm363_vm14, %v933_v1, 0.0  ;;  %vm366_vm6 = vcmp.eq.s32.totalorder %v743_v19, 7 }
  0x8c   :  { %vm947_vm15 = vmand %vm1089_vm7, %vm227_vm10  ;;  %vm1092_vm5 = vcmp.eq.s32.totalorder %v600_v39, 7  ;;  %v962_v10 = vsel %vm737_vm8, %v592_v35, %v721_v43  ;;  %v365_v12 = vadd.f32 %v364_v8, %v353_v63  ;;  %v966_v13 = vsub.f32 %v712_v41, %v544_v33 }
  0x8d   :  { %v372_v17 = vsel %vm1092_vm5, %v933_v1, 0.0  ;;  %vm224_vm4 = vmand %vm916_vm3, %vm223_vm9  ;;  %v356_v15 = vadd.f32 %v355_v3, %v344_v62  ;;  %vm375_vm10 = vcmp.eq.s32.totalorder %v611_v42, 8  ;;  %vm1093_vm0 = vcmp.ne.s32.totalorder %v611_v42, 9 }
  0x8e   :  { %v373_v22 = vadd.f32 %v372_v17, %v361_v0  ;;  %v225_v57 = vsel %vm224_vm4, %v584_v25, %v219_v5  ;;  %v226_v6 = vsel %vm224_vm4, 7, %v220_v9  ;;  %vm975_vm8 = vmand %vm1093_vm0, %vm233_vm11  ;;  %v367_v47 = vsel %vm366_vm6, %v933_v1, 0.0 }
  0x8f   :  { %vm229_vm1 = vcmp.gt.f32.partialorder %v588_v30, %v225_v57  ;;  %v376_v33 = vsel %vm375_vm10, %v966_v13, 0.0  ;;  %vm1096_vm13 = vcmp.eq.s32.totalorder %v600_v39, 8  ;;  %vm378_vm11 = vcmp.eq.s32.totalorder %v743_v19, 8 }
  0x90   :  { %v384_v25 = vsel %vm1096_vm13, %v966_v13, 0.0  ;;  %vm986_vm3 = vmand %vm947_vm15, %vm229_vm1  ;;  %v377_v18 = vadd.f32 %v376_v33, %v365_v12  ;;  %v386_v32 = vsub.f32 %v712_v41, %v547_v37  ;;  %v272_v38 = vadd.f32 %v962_v10, %v775_v21 }
  0x91   :  { %v385_v28 = vadd.f32 %v384_v25, %v373_v22  ;;  %v231_v34 = vsel %vm986_vm3, %v588_v30, %v225_v57  ;;  %v232_v23 = vsel %vm986_vm3, 8, %v226_v6  ;;  %vm387_vm2 = vcmp.eq.s32.totalorder %v611_v42, 9 }
  0x92   :  { %vm235_vm12 = vcmp.gt.f32.partialorder %v592_v35, %v231_v34  ;;  %v388_v7 = vsel %vm387_vm2, %v386_v32, 0.0  ;;  %vm1099_vm14 = vcmp.eq.s32.totalorder %v600_v39, 9  ;;  %v368_v37 = vadd.f32 %v367_v47, %v356_v15 }
  0x93   :  { %v396_v44 = vsel %vm1099_vm14, %v386_v32, 0.0  ;;  %vm236_vm9 = vmand %vm975_vm8, %vm235_vm12  ;;  %v379_v30 = vsel %vm378_vm11, %v966_v13, 0.0  ;;  %v389_v41 = vadd.f32 %v388_v7, %v377_v18  ;;  %vm390_vm7 = vcmp.eq.s32.totalorder %v743_v19, 9 }
  0x94   :  { %v397_v20 = vadd.f32 %v396_v44, %v385_v28  ;;  %v238_v48 = vsel %vm236_vm9, 9, %v232_v23  ;;  %v237_v51 = vsel %vm236_vm9, %v592_v35, %v231_v34  ;;  %v424_v42 = vmul.f32 %v703_v36, %v962_v10 }
  0x95   :  { %v416_v52 = vcvt.s32.f32 %v238_v48  ;;  %v273_v26 = vadd.f32 %v272_v38, %v237_v51  ;;  %vm285_vm15 = vcmp.eq.s32.totalorder %v238_v48, 0  ;;  %vm297_vm6 = vcmp.eq.s32.totalorder %v238_v48, 1 }
  0x96   :  { %445 = vst [vmem:[%s1042_s2 + $0x28] sm:$0xff] %v397_v20  ;;  %v286_v39 = vsel %vm285_vm15, %v725_v45, 0.0  ;;  %v298_v53 = vsel %vm297_vm6, %v729_v46, 0.0  ;;  %vm309_vm5 = vcmp.eq.s32.totalorder %v238_v48, 2  ;;  %vm321_vm4 = vcmp.eq.s32.totalorder %v238_v48, 3 }
  0x97   :  { %446 = vst [vmem:[%s1042_s2 + $0x30] sm:$0xff] %v424_v42  ;;  %vm1100_vm10 = vcmp.lt.f32.partialorder %v693_v24, 0.1  ;;  %473 = vrcp.f32 %v273_v26  ;;  %v299_v11 = vadd.f32 %v298_v53, %v286_v39  ;;  %v310_v4 = vsel %vm309_vm5, %v755_v50, 0.0 }
  0x98   :  { %v417_v35 = vsel %vm1100_vm10, %v416_v52, -1.0  ;;  %v322_v45 = vsel %vm321_vm4, %v824_v2, 0.0  ;;  %vm333_vm1 = vcmp.eq.s32.totalorder %v238_v48, 4  ;;  %v380_v46 = vadd.f32 %v379_v30, %v368_v37 }
  0x99   :  { %443 = vst [vmem:[%s1042_s2 + $0x18] sm:$0xff] %v417_v35  ;;  %v311_v54 = vadd.f32 %v310_v4, %v299_v11  ;;  %vm345_vm0 = vcmp.eq.s32.totalorder %v238_v48, 5  ;;  %v391_v55 = vsel %vm390_vm7, %v386_v32, 0.0  ;;  %v334_v24 = vsel %vm333_vm1, %v851_v27, 0.0 }
  0x9a   :  { %vm357_vm8 = vcmp.eq.s32.totalorder %v238_v48, 6  ;;  %v346_v58 = vsel %vm345_vm0, %v879_v49, 0.0  ;;  %v392_v50 = vadd.f32 %v391_v55, %v380_v46  ;;  %vm369_vm13 = vcmp.eq.s32.totalorder %v238_v48, 7 }
  0x9b   :  { %v323_v40 = vadd.f32 %v322_v45, %v311_v54  ;;  %v358_v61 = vsel %vm357_vm8, %v906_v56, 0.0  ;;  %vm381_vm3 = vcmp.eq.s32.totalorder %v238_v48, 8  ;;  %v370_v19 = vsel %vm369_vm13, %v933_v1, 0.0 }
  0x9c   :  { %vm393_vm11 = vcmp.eq.s32.totalorder %v238_v48, 9  ;;  %v382_v49 = vsel %vm381_vm3, %v966_v13, 0.0  ;;  %v404_v8 = vsub.f32 1.0, %v703_v36 }
  0x9d   :  { %v474_v59 = vpop.eup %473  ;;  %v335_v60 = vadd.f32 %v334_v24, %v323_v40  ;;  %v394_v3 = vsel %vm393_vm11, %v386_v32, 0.0 }
  0x9e   :  { %v275_v29 = vmul.f32 %v474_v59, %v775_v21  ;;  %v276_v2 = vmul.f32 %v474_v59, %v962_v10  ;;  %v277_v14 = vmul.f32 %v474_v59, %v237_v51  ;;  %v405_v56 = vmul.f32 %v404_v8, %v397_v20 }
  0x9f   :  { %v347_v62 = vadd.f32 %v346_v58, %v335_v60 }
  0xa0   :  { %v398_v27 = vmul.f32 %v389_v41, %v275_v29  ;;  %v399_v63 = vmul.f32 %v392_v50, %v276_v2 }
  0xa1   :  { %v359_v0 = vadd.f32 %v358_v61, %v347_v62 }
  0xa2   :  { %v400_v5 = vadd.f32 %v399_v63, %v398_v27 }
  0xa3   :  { %v371_v9 = vadd.f32 %v370_v19, %v359_v0 }
  0xa5   :  { %v383_v31 = vadd.f32 %v382_v49, %v371_v9 }
  0xa7   :  { %v395_v21 = vadd.f32 %v394_v3, %v383_v31 }
  0xa9   :  { %v401_v17 = vmul.f32 %v395_v21, %v277_v14 }
  0xab   :  { %v402_v10 = vadd.f32 %v401_v17, %v400_v5 }
  0xad   :  { %v403_v12 = vmul.f32 %v703_v36, %v402_v10 }
  0xaf   :  { %v406_v22 = vadd.f32 %v405_v56, %v403_v12 }
  0xb1   :  { %444 = vst [vmem:[%s1042_s2 + $0x20] sm:$0xff] %v406_v22 }

</bundles_post_ra>
